<compile_context>
chip_gen: v7x
topology: tpu7x:2x2x1
jax: 0.10.0
libtpu: 0.0.40
codegen_flags: <defaults>
</compile_context>

<pallas_src>
import functools

import jax
import jax.numpy as jnp
from jax import lax
from jax.experimental import pallas as pl
from jax.experimental.pallas import tpu as pltpu

LAYERS = [3, 20, 20, 20, 20, 20, 20, 1]
HID = 20
N_HIDDEN = len(LAYERS) - 3          # number of 20x20 hidden layers (= 5)
CHUNK = 512                         # vreg-resident batch width (lanes)
MAX_CHUNKS_PER_BLOCK = 16           # pallas block = up to 16*512 = 8192 lanes


def _round_up(a, m):
    return -(-a // m) * m


def _choose_tiling(n, max_chunk=CHUNK, max_chunks_per_block=MAX_CHUNKS_PER_BLOCK):
    """Returns (chunk, chunks_per_block, grid, n_pad)."""
    if n <= 2 * max_chunk:
        # Small batch: one chunk per block, grid of 2 so both v7x TCs get work.
        chunk = max(256, _round_up(_round_up(n, 2) // 2, 256))
        return chunk, 1, 2, 2 * chunk
    chunk = max_chunk
    n_chunks = -(-n // chunk)
    # Cap chunks/block so the grid stays >= 2 (v7x megacore sharding).
    cpb = max(1, min(max_chunks_per_block, -(-n_chunks // 2)))
    grid = -(-n_chunks // cpb)
    if grid % 2 == 1:
        grid += 1                    # even grid splits cleanly across 2 TCs
    return chunk, cpb, grid, grid * cpb * chunk


def dnn_kernel(x_ref, w_ref, b_ref, o_ref, *, n_chunks, chunk):
    """x_ref: (3, block_b); w_ref: (7, 20, 20); b_ref: (7, 20, chunk);
    o_ref: (1, block_b). Batch on lanes."""
    # Constant (per-block) operands, hoisted out of the chunk loop.
    w0 = w_ref[0][:, 0:3]            # (20, 3)   -- layer 0 weight
    b0 = b_ref[0]                    # (20, chunk), lane-replicated bias
    wl = w_ref[6][:, 0:1]            # (20, 1)   -- last layer weight (transposed)
    bl = b_ref[6][0:1, :]            # (1, chunk)

    def body(c, carry):
        off = pl.multiple_of(c * chunk, chunk)
        x = x_ref[:, pl.ds(off, chunk)]          # (3, chunk)

        # Layer 0 (K=3): unrolled VPU broadcast-FMA -- skip the MXU round-trip.
        h = b0 + (w0[:, 0:1] * x[0:1, :]
                  + w0[:, 1:2] * x[1:2, :]
                  + w0[:, 2:3] * x[2:3, :])      # (20, chunk)
        h = jnp.tanh(h)

        # Hidden 20x20 layers on the MXU; N = chunk is the lane-dense dim.
        for i in range(N_HIDDEN):
            h = jnp.dot(w_ref[1 + i], h,
                        preferred_element_type=jnp.float32,
                        precision=lax.Precision.HIGHEST) + b_ref[1 + i]
            h = jnp.tanh(h)

        # Final layer (out dim = 1): lane-wise multiply + sublane reduce (XLU),
        # stored as a lane-dense (1, chunk) slab.
        out = jnp.sum(wl * h, axis=0, keepdims=True) + bl
        o_ref[:, pl.ds(off, chunk)] = out.astype(o_ref.dtype)
        return carry

    lax.fori_loop(0, n_chunks, body, 0, unroll=True)


def init_params(key, layers):
    """Deterministic init mirroring torch.nn.Linear default
    (U(-k, k), k = 1/sqrt(fan_in)); weights (out, in), biases (out,)."""
    params = []
    for i in range(len(layers) - 1):
        fan_in, fan_out = layers[i], layers[i + 1]
        k = float(fan_in) ** -0.5
        key, kw, kb = jax.random.split(key, 3)
        w = jax.random.uniform(kw, (fan_out, fan_in), jnp.float32, -k, k)
        b = jax.random.uniform(kb, (fan_out,), jnp.float32, -k, k)
        params.append((w, b))
    return params


def pack_params(params, chunk):
    """Pack all 7 (w, b) pairs into two resident slabs.

    W slab: (7, 20, 20)  -- layer 0 occupies [:, :3], last layer column 0.
    B slab: (7, 20, chunk) -- biases pre-broadcast to the chunk lane width.
    """
    n_layers = len(params)
    W = jnp.zeros((n_layers, HID, HID), jnp.float32)
    B = jnp.zeros((n_layers, HID, chunk), jnp.float32)

    w0, b0 = params[0]                                     # (20, 3), (20,)
    W = W.at[0, :, :LAYERS[0]].set(w0)
    B = B.at[0].set(jnp.broadcast_to(b0[:, None], (HID, chunk)))

    for i in range(1, n_layers - 1):                       # hidden 20x20 layers
        w, b = params[i]
        W = W.at[i].set(w)
        B = B.at[i].set(jnp.broadcast_to(b[:, None], (HID, chunk)))

    wl, bl = params[-1]                                    # (1, 20), (1,)
    W = W.at[n_layers - 1, :, 0].set(wl[0])                # store transposed
    B = B.at[n_layers - 1, 0].set(jnp.broadcast_to(bl, (chunk,)))
    return W, B


def dnn_forward(x, params):
    n, in_dim = x.shape
    assert in_dim == LAYERS[0]
    chunk, cpb, grid, n_pad = _choose_tiling(n)
    block_b = cpb * chunk

    # Batch on lanes; zero-pad the batch tail (padded lanes flow through
    # tanh(bias) chains -- finite -- and are sliced off below).
    xt = jnp.pad(x.astype(jnp.float32).T, ((0, 0), (0, n_pad - n)))

    W, B = pack_params(params, chunk)

    kernel = functools.partial(dnn_kernel, n_chunks=cpb, chunk=chunk)

    out = pl.pallas_call(
        kernel,
        grid=(grid,),
        in_specs=[
            pl.BlockSpec((LAYERS[0], block_b), lambda i: (0, i)),
            pl.BlockSpec(W.shape, lambda i: (0, 0, 0)),   # resident weight slab
            pl.BlockSpec(B.shape, lambda i: (0, 0, 0)),   # resident bias slab
        ],
        out_specs=pl.BlockSpec((LAYERS[-1], block_b), lambda i: (0, i)),
        out_shape=jax.ShapeDtypeStruct((LAYERS[-1], n_pad), jnp.float32),
        compiler_params=pltpu.CompilerParams(
            dimension_semantics=("parallel",)),
    )(xt, W, B)

    return out[:, :n].T                                    # (n, 1)


def dnn_reference(x, params):
    h = x.astype(jnp.float32)
    for i, (w, b) in enumerate(params):
        h = jnp.dot(h, w.T, precision=lax.Precision.HIGHEST) + b
        if i < len(params) - 1:
            h = jnp.tanh(h)
    return h


if __name__ == "__main__":
    key = jax.random.PRNGKey(0)
    key, kx, kp = jax.random.split(key, 3)

    # Non-multiple of the chunk: exercises padding; tiling gives grid=(2,).
    batch = 1000
    x = jax.random.normal(kx, (batch, LAYERS[0]), jnp.float32)
    params = init_params(kp, LAYERS)

    out = jax.block_until_ready(dnn_forward(x, params))
    ref = dnn_reference(x, params)

    assert out.shape == (batch, LAYERS[-1])
    assert jnp.allclose(out, ref, atol=1e-5, rtol=1e-5), "mismatch vs reference"

    print("KERNEL_OK")
</pallas_src>

<mosaic_0001>
module attributes {stable_mosaic.version = 11 : i64} {
  func.func @dnn_kernel(%arg0: i32, %arg1: memref<3x512xf32, #tpu.memory_space<vmem>>, %arg2: memref<7x20x20xf32, #tpu.memory_space<vmem>>, %arg3: memref<7x20x512xf32, #tpu.memory_space<vmem>>, %arg4: memref<1x512xf32, #tpu.memory_space<vmem>>) attributes {dimension_semantics = [#tpu.dimension_semantics<parallel>], iteration_bounds = array<i64: 2>, scalar_prefetch = 0 : i64, scratch_operands = 0 : i64, tpu.core_type = #tpu.core_type<tc>, window_params = [{transform_indices = @transform_0, window_bounds = array<i64: 3, 512>}, {pipeline_mode = #tpu.pipeline_mode<synchronous>, transform_indices = @transform_1, window_bounds = array<i64: 7, 20, 20>}, {pipeline_mode = #tpu.pipeline_mode<synchronous>, transform_indices = @transform_2, window_bounds = array<i64: 7, 20, 512>}, {transform_indices = @transform_3, window_bounds = array<i64: 1, 512>}]} {
    %c0 = arith.constant 0 : index
    %c0_0 = arith.constant 0 : index
    %c0_1 = arith.constant 0 : index
    %0 = vector.load %arg2[%c0, %c0_0, %c0_1] : memref<7x20x20xf32, #tpu.memory_space<vmem>>, vector<1x20x20xf32>
    %1 = vector.shape_cast %0 : vector<1x20x20xf32> to vector<20x20xf32>
    %2 = vector.extract_strided_slice %1 {offsets = [0, 0], sizes = [20, 3], strides = [1, 1]} : vector<20x20xf32> to vector<20x3xf32>
    %c0_2 = arith.constant 0 : index
    %c0_3 = arith.constant 0 : index
    %c0_4 = arith.constant 0 : index
    %3 = vector.load %arg3[%c0_2, %c0_3, %c0_4] : memref<7x20x512xf32, #tpu.memory_space<vmem>>, vector<1x20x512xf32>
    %4 = vector.shape_cast %3 : vector<1x20x512xf32> to vector<20x512xf32>
    %c6 = arith.constant 6 : index
    %c0_5 = arith.constant 0 : index
    %c0_6 = arith.constant 0 : index
    %5 = vector.load %arg2[%c6, %c0_5, %c0_6] : memref<7x20x20xf32, #tpu.memory_space<vmem>>, vector<1x20x20xf32>
    %6 = vector.shape_cast %5 : vector<1x20x20xf32> to vector<20x20xf32>
    %7 = vector.extract_strided_slice %6 {offsets = [0, 0], sizes = [20, 1], strides = [1, 1]} : vector<20x20xf32> to vector<20x1xf32>
    %c6_7 = arith.constant 6 : index
    %c0_8 = arith.constant 0 : index
    %c0_9 = arith.constant 0 : index
    %8 = vector.load %arg3[%c6_7, %c0_8, %c0_9] : memref<7x20x512xf32, #tpu.memory_space<vmem>>, vector<1x20x512xf32>
    %9 = vector.shape_cast %8 : vector<1x20x512xf32> to vector<20x512xf32>
    %10 = vector.extract_strided_slice %9 {offsets = [0, 0], sizes = [1, 512], strides = [1, 1]} : vector<20x512xf32> to vector<1x512xf32>
    %c0_i32 = arith.constant 0 : i32
    %c512_i32 = arith.constant 512 : i32
    %11 = arith.muli %c0_i32, %c512_i32 : i32
    %12 = tpu.assume_multiple %11, 512 : i32
    %c0_10 = arith.constant 0 : index
    %13 = arith.index_cast %12 : i32 to index
    %14 = vector.load %arg1[%c0_10, %13] : memref<3x512xf32, #tpu.memory_space<vmem>>, vector<3x512xf32>
    %15 = vector.extract_strided_slice %2 {offsets = [0, 0], sizes = [20, 1], strides = [1, 1]} : vector<20x3xf32> to vector<20x1xf32>
    %16 = vector.extract_strided_slice %14 {offsets = [0, 0], sizes = [1, 512], strides = [1, 1]} : vector<3x512xf32> to vector<1x512xf32>
    %17 = vector.broadcast %15 : vector<20x1xf32> to vector<20x512xf32>
    %18 = vector.broadcast %16 : vector<1x512xf32> to vector<20x512xf32>
    %19 = arith.mulf %17, %18 : vector<20x512xf32>
    %20 = vector.extract_strided_slice %2 {offsets = [0, 1], sizes = [20, 1], strides = [1, 1]} : vector<20x3xf32> to vector<20x1xf32>
    %21 = vector.extract_strided_slice %14 {offsets = [1, 0], sizes = [1, 512], strides = [1, 1]} : vector<3x512xf32> to vector<1x512xf32>
    %22 = vector.broadcast %20 : vector<20x1xf32> to vector<20x512xf32>
    %23 = vector.broadcast %21 : vector<1x512xf32> to vector<20x512xf32>
    %24 = arith.mulf %22, %23 : vector<20x512xf32>
    %25 = arith.addf %19, %24 : vector<20x512xf32>
    %26 = vector.extract_strided_slice %2 {offsets = [0, 2], sizes = [20, 1], strides = [1, 1]} : vector<20x3xf32> to vector<20x1xf32>
    %27 = vector.extract_strided_slice %14 {offsets = [2, 0], sizes = [1, 512], strides = [1, 1]} : vector<3x512xf32> to vector<1x512xf32>
    %28 = vector.broadcast %26 : vector<20x1xf32> to vector<20x512xf32>
    %29 = vector.broadcast %27 : vector<1x512xf32> to vector<20x512xf32>
    %30 = arith.mulf %28, %29 : vector<20x512xf32>
    %31 = arith.addf %25, %30 : vector<20x512xf32>
    %32 = arith.addf %4, %31 : vector<20x512xf32>
    %33 = math.tanh %32 : vector<20x512xf32>
    %c1 = arith.constant 1 : index
    %c0_11 = arith.constant 0 : index
    %c0_12 = arith.constant 0 : index
    %34 = vector.load %arg2[%c1, %c0_11, %c0_12] : memref<7x20x20xf32, #tpu.memory_space<vmem>>, vector<1x20x20xf32>
    %35 = vector.shape_cast %34 : vector<1x20x20xf32> to vector<20x20xf32>
    %cst = arith.constant dense<0.000000e+00> : vector<20x512xf32>
    %36 = tpu.matmul %35, %33, %cst {dimension_numbers = #tpu.dot_dimension_numbers<[1], [0], [0], [1], [0, 0, 1, 1], [], []>, precision = #tpu.contract_precision<fp32>} : vector<20x20xf32>, vector<20x512xf32>, vector<20x512xf32> -> vector<20x512xf32>
    %c1_13 = arith.constant 1 : index
    %c0_14 = arith.constant 0 : index
    %c0_15 = arith.constant 0 : index
    %37 = vector.load %arg3[%c1_13, %c0_14, %c0_15] : memref<7x20x512xf32, #tpu.memory_space<vmem>>, vector<1x20x512xf32>
    %38 = vector.shape_cast %37 : vector<1x20x512xf32> to vector<20x512xf32>
    %39 = arith.addf %36, %38 : vector<20x512xf32>
    %40 = math.tanh %39 : vector<20x512xf32>
    %c2 = arith.constant 2 : index
    %c0_16 = arith.constant 0 : index
    %c0_17 = arith.constant 0 : index
    %41 = vector.load %arg2[%c2, %c0_16, %c0_17] : memref<7x20x20xf32, #tpu.memory_space<vmem>>, vector<1x20x20xf32>
    %42 = vector.shape_cast %41 : vector<1x20x20xf32> to vector<20x20xf32>
    %cst_18 = arith.constant dense<0.000000e+00> : vector<20x512xf32>
    %43 = tpu.matmul %42, %40, %cst_18 {dimension_numbers = #tpu.dot_dimension_numbers<[1], [0], [0], [1], [0, 0, 1, 1], [], []>, precision = #tpu.contract_precision<fp32>} : vector<20x20xf32>, vector<20x512xf32>, vector<20x512xf32> -> vector<20x512xf32>
    %c2_19 = arith.constant 2 : index
    %c0_20 = arith.constant 0 : index
    %c0_21 = arith.constant 0 : index
    %44 = vector.load %arg3[%c2_19, %c0_20, %c0_21] : memref<7x20x512xf32, #tpu.memory_space<vmem>>, vector<1x20x512xf32>
    %45 = vector.shape_cast %44 : vector<1x20x512xf32> to vector<20x512xf32>
    %46 = arith.addf %43, %45 : vector<20x512xf32>
    %47 = math.tanh %46 : vector<20x512xf32>
    %c3 = arith.constant 3 : index
    %c0_22 = arith.constant 0 : index
    %c0_23 = arith.constant 0 : index
    %48 = vector.load %arg2[%c3, %c0_22, %c0_23] : memref<7x20x20xf32, #tpu.memory_space<vmem>>, vector<1x20x20xf32>
    %49 = vector.shape_cast %48 : vector<1x20x20xf32> to vector<20x20xf32>
    %cst_24 = arith.constant dense<0.000000e+00> : vector<20x512xf32>
    %50 = tpu.matmul %49, %47, %cst_24 {dimension_numbers = #tpu.dot_dimension_numbers<[1], [0], [0], [1], [0, 0, 1, 1], [], []>, precision = #tpu.contract_precision<fp32>} : vector<20x20xf32>, vector<20x512xf32>, vector<20x512xf32> -> vector<20x512xf32>
    %c3_25 = arith.constant 3 : index
    %c0_26 = arith.constant 0 : index
    %c0_27 = arith.constant 0 : index
    %51 = vector.load %arg3[%c3_25, %c0_26, %c0_27] : memref<7x20x512xf32, #tpu.memory_space<vmem>>, vector<1x20x512xf32>
    %52 = vector.shape_cast %51 : vector<1x20x512xf32> to vector<20x512xf32>
    %53 = arith.addf %50, %52 : vector<20x512xf32>
    %54 = math.tanh %53 : vector<20x512xf32>
    %c4 = arith.constant 4 : index
    %c0_28 = arith.constant 0 : index
    %c0_29 = arith.constant 0 : index
    %55 = vector.load %arg2[%c4, %c0_28, %c0_29] : memref<7x20x20xf32, #tpu.memory_space<vmem>>, vector<1x20x20xf32>
    %56 = vector.shape_cast %55 : vector<1x20x20xf32> to vector<20x20xf32>
    %cst_30 = arith.constant dense<0.000000e+00> : vector<20x512xf32>
    %57 = tpu.matmul %56, %54, %cst_30 {dimension_numbers = #tpu.dot_dimension_numbers<[1], [0], [0], [1], [0, 0, 1, 1], [], []>, precision = #tpu.contract_precision<fp32>} : vector<20x20xf32>, vector<20x512xf32>, vector<20x512xf32> -> vector<20x512xf32>
    %c4_31 = arith.constant 4 : index
    %c0_32 = arith.constant 0 : index
    %c0_33 = arith.constant 0 : index
    %58 = vector.load %arg3[%c4_31, %c0_32, %c0_33] : memref<7x20x512xf32, #tpu.memory_space<vmem>>, vector<1x20x512xf32>
    %59 = vector.shape_cast %58 : vector<1x20x512xf32> to vector<20x512xf32>
    %60 = arith.addf %57, %59 : vector<20x512xf32>
    %61 = math.tanh %60 : vector<20x512xf32>
    %c5 = arith.constant 5 : index
    %c0_34 = arith.constant 0 : index
    %c0_35 = arith.constant 0 : index
    %62 = vector.load %arg2[%c5, %c0_34, %c0_35] : memref<7x20x20xf32, #tpu.memory_space<vmem>>, vector<1x20x20xf32>
    %63 = vector.shape_cast %62 : vector<1x20x20xf32> to vector<20x20xf32>
    %cst_36 = arith.constant dense<0.000000e+00> : vector<20x512xf32>
    %64 = tpu.matmul %63, %61, %cst_36 {dimension_numbers = #tpu.dot_dimension_numbers<[1], [0], [0], [1], [0, 0, 1, 1], [], []>, precision = #tpu.contract_precision<fp32>} : vector<20x20xf32>, vector<20x512xf32>, vector<20x512xf32> -> vector<20x512xf32>
    %c5_37 = arith.constant 5 : index
    %c0_38 = arith.constant 0 : index
    %c0_39 = arith.constant 0 : index
    %65 = vector.load %arg3[%c5_37, %c0_38, %c0_39] : memref<7x20x512xf32, #tpu.memory_space<vmem>>, vector<1x20x512xf32>
    %66 = vector.shape_cast %65 : vector<1x20x512xf32> to vector<20x512xf32>
    %67 = arith.addf %64, %66 : vector<20x512xf32>
    %68 = math.tanh %67 : vector<20x512xf32>
    %69 = vector.broadcast %7 : vector<20x1xf32> to vector<20x512xf32>
    %70 = arith.mulf %69, %68 : vector<20x512xf32>
    %cst_40 = arith.constant dense<0.000000e+00> : vector<512xf32>
    %71 = vector.multi_reduction <add>, %70, %cst_40 [0] : vector<20x512xf32> to vector<512xf32>
    %72 = vector.shape_cast %71 : vector<512xf32> to vector<1x512xf32>
    %73 = arith.addf %72, %10 : vector<1x512xf32>
    %c0_41 = arith.constant 0 : index
    %74 = arith.index_cast %12 : i32 to index
    %75 = vector.load %arg4[%c0_41, %74] : memref<1x512xf32, #tpu.memory_space<vmem>>, vector<1x512xf32>
    tpu.vector_store %arg4[%c0_41, %74], %73 {strides = array<i32>} : memref<1x512xf32, #tpu.memory_space<vmem>>, vector<1x512xf32>,
    %c1_i32 = arith.constant 1 : i32
    return
  }
  func.func @transform_0(%arg0: i32) -> (i32, i32) {
    %c0_i32 = arith.constant 0 : i32
    %c0_i32_0 = arith.constant 0 : i32
    return %c0_i32, %arg0 : i32, i32
  }
  func.func @transform_1(%arg0: i32) -> (i32, i32, i32) {
    %c0_i32 = arith.constant 0 : i32
    %c0_i32_0 = arith.constant 0 : i32
    %c0_i32_1 = arith.constant 0 : i32
    %c0_i32_2 = arith.constant 0 : i32
    return %c0_i32, %c0_i32_0, %c0_i32_1 : i32, i32, i32
  }
  func.func @transform_2(%arg0: i32) -> (i32, i32, i32) {
    %c0_i32 = arith.constant 0 : i32
    %c0_i32_0 = arith.constant 0 : i32
    %c0_i32_1 = arith.constant 0 : i32
    %c0_i32_2 = arith.constant 0 : i32
    return %c0_i32, %c0_i32_0, %c0_i32_1 : i32, i32, i32
  }
  func.func @transform_3(%arg0: i32) -> (i32, i32) {
    %c0_i32 = arith.constant 0 : i32
    %c0_i32_0 = arith.constant 0 : i32
    return %c0_i32, %arg0 : i32, i32
  }
}

</mosaic_0001>

<bundles_post_ra>
// kernel: tpu_custom_call.1
= control target key start
LH: loop header
LB: loop body
LE: loop exit
PB: predicated region body
PF: predicated region fallthrough
CT: control target
= control target key end

     0   :  { %8 = vsyncpa [#allocation3], 0  ;;  %s9722_s0 = inlined_call_operand.vmem [shape: f32[3,1024], index: 0, kind: input, shape index: {}]   ;;  %s9723_s1 = inlined_call_operand.vmem [shape: f32[7,20,20], index: 1, kind: input, shape index: {}]   ;;  %s9724_s2 = inlined_call_operand.vmem [shape: f32[7,20,512], index: 2, kind: input, shape index: {}]   ;;  %s9725_s3 = inlined_call_operand.hbm [shape: f32[1,1024], index: 3, kind: output, shape index: {}]  }
   0x1   :  { %10 = vsyncpa [#allocation3 + $0x1], 0  ;;  %s7990_s12 = smov 0   ;;  %s7992_s13 = smov 0  }
   0x2   :  { %s7994_s14 = smov 0   ;;  %s7996_s15 = smov 0  }
   0x3 LB: > { %s8011_s16 = sadd.s32 4294967295, %s7962_s15   ;;  %s7008_s17 = sadd.s32 4294967294, %s7962_s15   ;;  %s7962_s15 = sphi %s7996_s15, %s9731_s15   ;;  %s7958_s14 = sphi %s7994_s14, %s9730_s14   ;;  %s7954_s13 = sphi %s7992_s13, %s9729_s13   ;;  %s7950_s12 = sphi %s7990_s12, %s9728_s12  }
   0x4   : > { %s8015_s18 = sadd.s32 1, %s7962_s15   ;;  %s91_s19 = sadd.s32 1, %s7958_s14 }
   0x5   : > { %s88_s20 = ssub.s32 %s7962_s15, %s8015_s18  ;;  %p101_p0 = scmp.ne.s32.totalorder %s7958_s14, %s7954_s13 }
   0x6   : > { %p89_p1 = scmp.eq.s32.totalorder %s88_s20, 0  ;;  %p102_p2 = scmp.eq.s32.totalorder %s8011_s16, 1 }
   0x7   : > { %p107_p3 = scmp.ne.s32.totalorder %s7954_s13, %s7950_s12  ;;  %p108_p4 = scmp.eq.s32.totalorder %s7008_s17, 1 }
   0x8   : > { %s8026_s21 = scalar_select %p89_p1, %s7958_s14, %s91_s19  }
   0x9   : > { %p8028_p5 = por %p102_p2, %p101_p0  ;;  %p8032_p6 = por %p108_p4, %p107_p3 }
   0xa   : > { %p7011_p7 = scmp.ge.s32.totalorder %s7962_s15, 1  ;;  %p141_p8 = scmp.lt.s32.totalorder %s7962_s15, 3 }
   0xc   : > { %p142_p9 = pnand %p7011_p7, %p141_p8 }
   0xd   : > { %v172_v0 = vld [vmem:[%s9723_s1] sm:$0xff] (!%p142_p9)  ;;  %v7964_v1 = vmov (!%p142_p9), 1   ;;  %v7965_v2 = vmov (!%p142_p9), 0   ;;  %v173_v3 = vld [vmem:[%s9723_s1 + $0x8] sm:$0xff] (!%p142_p9)  ;;  %v7966_v4 = vmov (!%p142_p9), 2   ;;  %v7967_v6 = vmov (!%p142_p9), 0.0  }
   0xe   : > { %145 = sbr.rel (%p142_p9) target bundleno = 1727 (0x6bf), region = 32  ;;  %7748 = vset.pattern.permute.xlu1 (!%p142_p9), %v7964_v1  ;;  %7747 = vset.pattern.permute.xlu0 (!%p142_p9), %v7965_v2  ;;  %v174_v5 = vld [vmem:[%s9723_s1 + $0x10] sm:$0xf] (!%p142_p9)  ;;  %s7013_s30 = sshll.u32 (!%p142_p9), %s8011_s16, 2  ;;  %v215_v7 = vlaneseq (!%p142_p9)  ;;  %v7022_v15 = vld [vmem:[%s9723_s1 + $0x18] sm:$0xff] (!%p142_p9)  ;;  %vm448_vm0 = vcmask (!%p142_p9), 162816  }
   0xf   : > { %264 = vperm.xlu1 (!%p142_p9), %7748, %v172_v0   ;;  %200 = vperm.xlu0 (!%p142_p9), %7747, %v172_v0   ;;  %p166_p10 = scmp.lt.s32.totalorder (!%p142_p9), %s7013_s30, 7  ;;  %v450_v24 = vsel (!%p142_p9), %vm448_vm0, %v7022_v15, 0  ;;  %v7023_v27 = vld [vmem:[%s9723_s1 + $0x20] sm:$0xff] (!%p142_p9)  ;;  %vm458_vm1 = vcmask (!%p142_p9), 1043456   ;;  %s162_s20 = sand.u32 (!%p142_p9), 1, %s7954_s13  }
  0x10   : > { %541 = vmatprep.mubr.f32.mxu0 (!%p142_p9), %v7967_v6  ;;  %1156 = vmatprep.mubr.f32.mxu1 (!%p142_p9), %v7967_v6  ;;  %v8051_v8 = vshrl.u32 (!%p142_p9), %v215_v7, 7  ;;  %v8075_v35 = vand.u32 (!%p142_p9), 4294901760, %v450_v24  ;;  %v453_v41 = vsel (!%p142_p9), %vm448_vm0, %v7023_v27, 0  ;;  %s7012_s26 = sshll.u32 (!%p142_p9), %s162_s20, 2  ;;  %s7102_s27 = sshll.u32 (!%p142_p9), %s8011_s16, 6  ;;  %vm6931_vm2 = vcmp.lt.s32.totalorder (!%p142_p9), %v215_v7, 512 }
  0x11   : > { %v8101_v51 = vand.u32 (!%p142_p9), 4294901760, %v453_v41  ;;  %s164_s28 = scalar_lea.vmem (!%p142_p9), [#allocation2], %s7012_s26  ;;  %s9680_s5 = scalar_lea.hbm (!%p142_p9), %s9725_s3, %s7102_s27 }
  0x12   : > { %v277_v9 = vsub.s32 (!%p142_p9), 1, %v8051_v8  ;;  %v281_v10 = vsub.s32 (!%p142_p9), 5, %v8051_v8  ;;  %v217_v13 = vsub.s32 (!%p142_p9), 0, %v8051_v8  ;;  %v221_v14 = vsub.s32 (!%p142_p9), 4, %v8051_v8  ;;  %s6949_s29 = sshll.u32 (!%p142_p9), %s164_s28, 4  ;;  %s6935_s6 = scalar_lea.sflag (!%p142_p9), [#allocation3], %s162_s20  ;;  %s9682_s29 = int_to_ptr.vmem [resolvable:$true] %s6949_s29 }
  0x13   : > { %268 = vperm.xlu1 (!%p142_p9), %7748, %v173_v3   ;;  %205 = vperm.xlu0 (!%p142_p9), %7747, %v173_v3   ;;  %v349_v16 = vsub.s32 (!%p142_p9), 2, %v8051_v8  ;;  %v353_v17 = vsub.s32 (!%p142_p9), 6, %v8051_v8  ;;  %v8099_v50 = vsub.f32 (!%p142_p9), %v450_v24, %v8075_v35  ;;  %v180_v24 = vld [vmem:[%s9724_s2 + $0x28] sm:$0xff] (!%p142_p9)  ;;  %s7969_s16 = smov (!%p142_p9), [#allocation2]  }
  0x14   : > { %s7904_s8 = sshll.u32 (!%p142_p9), %s7969_s16, 4  ;;  %s7905_s8 = int_to_ptr.vmem [resolvable:$false] %s7904_s8 }
  0x15   : > { %s9733_s30 = smov (!%p166_p10, %s7013_s30), 7  ;;  %s7906_s9 = scalar_lea.vmem %s7905_s8, 128 }
  0x16   : > { %s7014_s4 = sshll.u32 %s9733_s30, 2  ;;  %p7907_p0 = scmp.lt.s32.totalorder %s9682_s29, %s7905_s8 }
  0x17   : > { %7750 = vset.pattern.permute.xlu1 %v7966_v4  ;;  %7749 = vset.pattern.permute.xlu0 %v7966_v4  ;;  %s169_s7 = scalar_lea.vmem %s9722_s0, %s7014_s4 }
  0x18   : > { %340 = vperm.xlu1 %7750, %v173_v3   ;;  %336 = vperm.xlu0 %7749, %v172_v0   ;;  %v196_v11 = vld [vmem:[%s169_s7] sm:$0x77]  ;;  %v197_v12 = vld [vmem:[%s169_s7 + $0x8] sm:$0x77]  ;;  %v8117_v3 = vand.u32 4294901760, %v8099_v50  ;;  %s7900_s7 = scalar_lea.vmem %s9682_s29, 64 }
  0x19   : > { %v278_v18 = vrot.slane %v196_v11, %v277_v9  ;;  %v282_v19 = vrot.slane %v196_v11, %v281_v10  ;;  %v286_v20 = vrot.slane %v197_v12, %v277_v9  ;;  %v218_v21 = vrot.slane %v196_v11, %v217_v13  ;;  %p7901_p11 = scmp.ne.s32.totalorder %s9682_s29, %s7900_s7  ;;  %p7908_p1 = scmp.lt.s32.totalorder %s7906_s9, %s7900_s7 }
  0x1a   : > { %v222_v22 = vrot.slane %v196_v11, %v221_v14  ;;  %v226_v23 = vrot.slane %v197_v12, %v217_v13  ;;  %v290_v25 = vrot.slane %v197_v12, %v281_v10  ;;  %v230_v26 = vrot.slane %v197_v12, %v221_v14 }
  0x1b   : > { %v350_v28 = vrot.slane %v196_v11, %v349_v16  ;;  %v354_v29 = vrot.slane %v196_v11, %v353_v17  ;;  %v358_v30 = vrot.slane %v197_v12, %v349_v16  ;;  %v362_v31 = vrot.slane %v197_v12, %v353_v17  ;;  %p7902_p12 = pnand %p7901_p11, %p8028_p5  ;;  %p7909_p2 = por %p7908_p1, %p7907_p0 }
  0x1c   : > { %7751 = vset.pattern.permute.xlu1 %v7965_v2  ;;  %7752 = vset.pattern.permute.xlu0 %v7964_v1  ;;  %v8069_v32 = vrot.slane %v278_v18, %v277_v9  ;;  %v8071_v33 = vrot.slane %v282_v19, %v277_v9  ;;  %v8073_v34 = vrot.slane %v286_v20, %v277_v9 }
  0x1d   : > { %210 = vperm.xlu1 %7751, %v174_v5   ;;  %272 = vperm.xlu0 %7752, %v174_v5   ;;  %v8077_v38 = vrot.slane %v218_v21, %v217_v13  ;;  %v8079_v39 = vrot.slane %v222_v22, %v217_v13  ;;  %v8081_v40 = vrot.slane %v226_v23, %v217_v13  ;;  %v7024_v22 = vld [vmem:[%s9723_s1 + $0x28] sm:$0xf]  ;;  %v179_v23 = vld [vmem:[%s9724_s2 + $0x20] sm:$0xff]  ;;  %p7903_p13 = pneg %p7902_p12 }
  0x1e   : > { %v8084_v42 = vrot.slane %v290_v25, %v277_v9  ;;  %v8086_v43 = vrot.slane %v230_v26, %v217_v13  ;;  %v8088_v44 = vrot.slane %v350_v28, %v349_v16  ;;  %v8090_v45 = vrot.slane %v354_v29, %v349_v16  ;;  %v181_v25 = vld [vmem:[%s9724_s2 + $0x30] sm:$0xff] }
  0x1f   : > { %v8092_v46 = vrot.slane %v358_v30, %v349_v16  ;;  %v8094_v47 = vrot.slane %v362_v31, %v349_v16  ;;  %v182_v30 = vld [vmem:[%s9724_s2 + $0x38] sm:$0xff]  ;;  %p7910_p3 = pnand %p7909_p2, %p7903_p13 }
  0x21   : > { %7753 = vset.pattern.permute.xlu1 %v7966_v4  ;;  %7755 = vset.pattern.permute.xlu0 %v7965_v2  ;;  %v8120_v4 = vsub.f32 %v453_v41, %v8101_v51 }
  0x22   : > { %344 = vperm.xlu1 %7753, %v174_v5  }
  0x26   : > { %7754 = vset.pattern.permute.xlu1 %v7965_v2 }
  0x8e   : > { %v265_v36 = vpop.permute.xlu1 %264  ;;  %v201_v37 = vpop.permute.xlu0 %200 }
  0x8f   : > { %v311_v48 = vmul.f32 %v8069_v32, %v265_v36  ;;  %v312_v49 = vmul.f32 %v8071_v33, %v265_v36  ;;  %v313_v52 = vmul.f32 %v8073_v34, %v265_v36  ;;  %v251_v53 = vmul.f32 %v8077_v38, %v201_v37 }
  0x90   : > { %v252_v54 = vmul.f32 %v8079_v39, %v201_v37  ;;  %v253_v55 = vmul.f32 %v8081_v40, %v201_v37  ;;  %v314_v2 = vmul.f32 %v8084_v42, %v265_v36  ;;  %v254_v5 = vmul.f32 %v8086_v43, %v201_v37 }
  0x91   : > { %v323_v9 = vadd.f32 %v311_v48, %v251_v53  ;;  %v175_v48 = vld [vmem:[%s9724_s2] sm:$0xff] }
  0x92   : > { %v269_v56 = vpop.permute.xlu1 %268  ;;  %v206_v57 = vpop.permute.xlu0 %205  ;;  %v324_v10 = vadd.f32 %v312_v49, %v252_v54  ;;  %v325_v11 = vadd.f32 %v313_v52, %v253_v55  ;;  %v176_v49 = vld [vmem:[%s9724_s2 + $0x8] sm:$0xff]  ;;  %v326_v52 = vadd.f32 %v314_v2, %v254_v5  ;;  %v456_v55 = vsel %vm448_vm0, %v7024_v22, 0  ;;  %v178_v2 = vld [vmem:[%s9724_s2 + $0x18] sm:$0xff] }
  0x93   : > { %v315_v58 = vmul.f32 %v8069_v32, %v269_v56  ;;  %v316_v59 = vmul.f32 %v8071_v33, %v269_v56  ;;  %v317_v60 = vmul.f32 %v8073_v34, %v269_v56  ;;  %v318_v61 = vmul.f32 %v8084_v42, %v269_v56  ;;  %v186_v22 = vld [vmem:[%s9724_s2 + $0x58] sm:$0xf] }
  0x94   : > { %v255_v62 = vmul.f32 %v8077_v38, %v206_v57  ;;  %v256_v63 = vmul.f32 %v8079_v39, %v206_v57  ;;  %v257_v0 = vmul.f32 %v8081_v40, %v206_v57  ;;  %v258_v1 = vmul.f32 %v8086_v43, %v206_v57 }
  0x96   : > { %v327_v12 = vadd.f32 %v315_v58, %v255_v62  ;;  %v328_v13 = vadd.f32 %v316_v59, %v256_v63  ;;  %v329_v14 = vadd.f32 %v317_v60, %v257_v0  ;;  %v330_v15 = vadd.f32 %v318_v61, %v258_v1  ;;  %v177_v63 = vld [vmem:[%s9724_s2 + $0x10] sm:$0xff] }
  0x97   : > { %v341_v16 = vpop.permute.xlu1 %340  ;;  %v337_v17 = vpop.permute.xlu0 %336 }
  0x98   : > { %v387_v18 = vmul.f32 %v8088_v44, %v341_v16  ;;  %v388_v19 = vmul.f32 %v8090_v45, %v341_v16  ;;  %v389_v20 = vmul.f32 %v8092_v46, %v341_v16  ;;  %v390_v21 = vmul.f32 %v8094_v47, %v341_v16 }
  0x99   : > { %v383_v26 = vmul.f32 %v8088_v44, %v337_v17  ;;  %v384_v27 = vmul.f32 %v8090_v45, %v337_v17  ;;  %v385_v28 = vmul.f32 %v8092_v46, %v337_v17  ;;  %v386_v29 = vmul.f32 %v8094_v47, %v337_v17 }
  0x9a   : > { %v399_v31 = vadd.f32 %v387_v18, %v327_v12  ;;  %v400_v36 = vadd.f32 %v388_v19, %v328_v13  ;;  %v401_v37 = vadd.f32 %v389_v20, %v329_v14  ;;  %v402_v41 = vadd.f32 %v390_v21, %v330_v15 }
  0x9b   : > { %v395_v53 = vadd.f32 %v383_v26, %v323_v9  ;;  %v396_v54 = vadd.f32 %v384_v27, %v324_v10  ;;  %v397_v59 = vadd.f32 %v385_v28, %v325_v11  ;;  %v398_v0 = vadd.f32 %v386_v29, %v326_v52 }
  0x9c   : > { %v411_v56 = vadd.f32 %v399_v31, %v179_v23  ;;  %v412_v57 = vadd.f32 %v400_v36, %v180_v24  ;;  %v413_v58 = vadd.f32 %v401_v37, %v181_v25  ;;  %v211_v60 = vpop.permute.xlu1 %210  ;;  %v273_v61 = vpop.permute.xlu0 %272  ;;  %v414_v62 = vadd.f32 %v402_v41, %v182_v30 }
  0x9d   : > { %v407_v1 = vadd.f32 %v395_v53, %v175_v48  ;;  %v408_v12 = vadd.f32 %v396_v54, %v176_v49  ;;  %v259_v5 = vmul.f32 %v8077_v38, %v211_v60  ;;  %v260_v9 = vmul.f32 %v8079_v39, %v211_v60 }
  0x9e   : > { %7756 = vtanh.f32 %v411_v56  ;;  %v261_v10 = vmul.f32 %v8081_v40, %v211_v60  ;;  %v262_v11 = vmul.f32 %v8086_v43, %v211_v60  ;;  %v319_v13 = vmul.f32 %v8069_v32, %v273_v61  ;;  %v183_v32 = vld [vmem:[%s9724_s2 + $0x40] sm:$0xf] }
  0x9f   : > { %7758 = vtanh.f32 %v412_v57  ;;  %v320_v14 = vmul.f32 %v8071_v33, %v273_v61  ;;  %v409_v15 = vadd.f32 %v397_v59, %v177_v63  ;;  %v321_v16 = vmul.f32 %v8073_v34, %v273_v61  ;;  %v184_v33 = vld [vmem:[%s9724_s2 + $0x48] sm:$0xf] }
  0xa0   : > { %7760 = vtanh.f32 %v413_v58  ;;  %v322_v17 = vmul.f32 %v8084_v42, %v273_v61  ;;  %v410_v18 = vadd.f32 %v398_v0, %v178_v2  ;;  %v331_v38 = vadd.f32 %v319_v13, %v259_v5 }
  0xa1   : > { %7762 = vtanh.f32 %v414_v62  ;;  %v332_v19 = vadd.f32 %v320_v14, %v260_v9  ;;  %v345_v39 = vpop.permute.xlu1 %344  ;;  %v333_v40 = vadd.f32 %v321_v16, %v261_v10  ;;  %v8184_v24 = vand.u32 4294901760, %v8120_v4 }
  0xa2   : > { %7764 = vtanh.f32 %v407_v1  ;;  %v334_v20 = vadd.f32 %v322_v17, %v262_v11  ;;  %v391_v43 = vmul.f32 %v8088_v44, %v345_v39  ;;  %v392_v34 = vmul.f32 %v8090_v45, %v345_v39  ;;  %v185_v44 = vld [vmem:[%s9724_s2 + $0x50] sm:$0xf] }
  0xa3   : > { %7766 = vtanh.f32 %v408_v12  ;;  %v393_v42 = vmul.f32 %v8092_v46, %v345_v39  ;;  %v394_v21 = vmul.f32 %v8094_v47, %v345_v39  ;;  %v8186_v25 = vand.u32 4294901760, %v456_v55 }
  0xa4   : > { %7768 = vtanh.f32 %v409_v15  ;;  %v403_v23 = vadd.f32 %v391_v43, %v331_v38  ;;  %v404_v45 = vadd.f32 %v392_v34, %v332_v19  ;;  %v545_v31 = vsub.f32 %v8099_v50, %v8117_v3 }
  0xa5   : > { %7770 = vtanh.f32 %v410_v18  ;;  %v405_v46 = vadd.f32 %v393_v42, %v333_v40  ;;  %v406_v26 = vadd.f32 %v394_v21, %v334_v20  ;;  %v556_v41 = vsub.f32 %v8120_v4, %v8184_v24 }
  0xa6   : > { %v415_v47 = vadd.f32 %v403_v23, %v183_v32  ;;  %v416_v27 = vadd.f32 %v404_v45, %v184_v33  ;;  %v8193_v48 = vsub.f32 %v456_v55, %v8186_v25  ;;  %v8199_v60 = vand.u32 4294901760, %v545_v31 }
  0xa7   : > { %v417_v28 = vadd.f32 %v405_v46, %v185_v44  ;;  %v418_v29 = vadd.f32 %v406_v26, %v186_v22  ;;  %v8202_v63 = vand.u32 4294901760, %v556_v41 }
  0xa8   : > { %v7757_v30 = vpop.eup %7756  ;;  %7772 = vtanh.f32 %v415_v47  ;;  %v8205_v0 = vand.u32 4294901760, %v8193_v48 }
  0xa9   : > { %v7759_v36 = vpop.eup %7758  ;;  %7774 = vtanh.f32 %v416_v27  ;;  %v477_v37 = vand.u32 4294901760, %v7757_v30 }
  0xaa   : > { %v7761_v49 = vpop.eup %7760  ;;  %7776 = vtanh.f32 %v417_v28  ;;  %v475_v52 = vand.u32 4294901760, %v7759_v36 }
  0xab   : > { %v7763_v53 = vpop.eup %7762  ;;  %7778 = vtanh.f32 %v418_v29  ;;  %v8195_v54 = vsub.f32 %v7757_v30, %v477_v37  ;;  %v1092_v56 = vand.u32 4294901760, %v7761_v49 }
  0xac   : > { %v7765_v57 = vpop.eup %7764  ;;  %v8197_v58 = vsub.f32 %v7759_v36, %v475_v52  ;;  %v1090_v59 = vand.u32 4294901760, %v7763_v53 }
  0xad   : > { %v7767_v61 = vpop.eup %7766  ;;  %v473_v62 = vand.u32 4294901760, %v7765_v57  ;;  %v595_v55 = vand.u32 4294901760, %v8195_v54  ;;  %v8209_v5 = vsub.f32 %v7761_v49, %v1092_v56 }
  0xae   : > { %v7769_v1 = vpop.eup %7768  ;;  %v471_v12 = vand.u32 4294901760, %v7767_v61  ;;  %v8207_v2 = vsub.f32 %v7763_v53, %v1090_v59  ;;  %v589_v9 = vand.u32 4294901760, %v8197_v58 }
  0xaf   : > { %v7771_v10 = vpop.eup %7770  ;;  %v8212_v11 = vpack.c.bf16 %v477_v37, %v473_v62  ;;  %v8214_v13 = vsub.f32 %v7765_v57, %v473_v62  ;;  %v1088_v14 = vand.u32 4294901760, %v7769_v1  ;;  %v596_v15 = vsub.f32 %v8195_v54, %v595_v55 }
  0xb0   : > { %v8219_v16 = vpack.c.bf16 %v475_v52, %v471_v12  ;;  %v8221_v17 = vsub.f32 %v7767_v61, %v471_v12  ;;  %v1086_v18 = vand.u32 4294901760, %v7771_v10  ;;  %v590_v38 = vsub.f32 %v8197_v58, %v589_v9 }
  0xb1   : > { %v8226_v19 = vpack.c.bf16 %v1092_v56, %v1088_v14  ;;  %v8228_v39 = vsub.f32 %v7769_v1, %v1088_v14  ;;  %v1204_v40 = vand.u32 4294901760, %v8207_v2  ;;  %v583_v20 = vand.u32 4294901760, %v8214_v13 }
  0xb2   : > { %v7773_v43 = vpop.eup %7772  ;;  %7104 = vmatprep.subr.bf16.mxu0 %v8219_v16  ;;  %v8233_v32 = vpack.c.bf16 %v1090_v59, %v1086_v18  ;;  %v8235_v33 = vsub.f32 %v7771_v10, %v1086_v18  ;;  %v577_v34 = vand.u32 4294901760, %v8221_v17  ;;  %v591_v42 = vand.u32 4294901760, %v590_v38 }
  0xb3   : > { %v7775_v21 = vpop.eup %7774  ;;  %7106 = vmatpush1.bf16.msra.mxu0 %v8212_v11  ;;  %v460_v44 = vsel %vm458_vm1, %v7773_v43, 0  ;;  %v1205_v22 = vsub.f32 %v8207_v2, %v1204_v40  ;;  %v584_v23 = vsub.f32 %v8214_v13, %v583_v20  ;;  %v597_v45 = vand.u32 4294901760, %v596_v15 }
  0xb4   : > { %v7777_v46 = vpop.eup %7776  ;;  %7128 = vmatprep.subr.bf16.mxu1 %v8233_v32  ;;  %v463_v26 = vsel %vm458_vm1, %v7775_v21, 0  ;;  %v8248_v47 = vand.u32 4294901760, %v460_v44  ;;  %v578_v27 = vsub.f32 %v8221_v17, %v577_v34  ;;  %v1192_v28 = vand.u32 4294901760, %v8235_v33 }
  0xb5   : > { %v7779_v29 = vpop.eup %7778  ;;  %7130 = vmatpush1.bf16.msra.mxu1 %v8226_v19  ;;  %v8255_v30 = vand.u32 4294901760, %v463_v26  ;;  %v466_v31 = vsel %vm458_vm1, %v7777_v46, 0  ;;  %v1206_v36 = vand.u32 4294901760, %v1205_v22  ;;  %v585_v37 = vand.u32 4294901760, %v584_v23 }
  0xb6   : > { %v469_v41 = vsel %vm458_vm1, %v7779_v29, 0  ;;  %v8260_v49 = vsub.f32 %v460_v44, %v8248_v47  ;;  %v8262_v52 = vand.u32 4294901760, %v466_v31  ;;  %v579_v53 = vand.u32 4294901760, %v578_v27 }
  0xb7   : > { %480 = vmatprep.subr.mxu0 %v8255_v30  ;;  %v8265_v56 = vand.u32 4294901760, %v469_v41  ;;  %v1193_v57 = vsub.f32 %v8235_v33, %v1192_v28  ;;  %v7109_v59 = vpack.c.bf16 %v597_v45, %v585_v37  ;;  %v1198_v61 = vand.u32 4294901760, %v8228_v39 }
  0xb8   : > { %482 = vmatpush1.msra.mxu0 %v8248_v47  ;;  %v8273_v62 = vsub.f32 %v466_v31, %v8262_v52  ;;  %v7107_v1 = vpack.c.bf16 %v591_v42, %v579_v53  ;;  %v1210_v12 = vand.u32 4294901760, %v8209_v5  ;;  %v8277_v10 = vsub.f32 %v463_v26, %v8255_v30 }
  0xb9   : > { %1095 = vmatprep.subr.mxu1 %v8265_v56  ;;  %547 = vmatmul.mubr.f32.vlgmr.msra.gmra.mrb[0].mxu0 %v8199_v60  ;;  %v1194_v14 = vand.u32 4294901760, %v1193_v57  ;;  %v1199_v15 = vsub.f32 %v8228_v39, %v1198_v61  ;;  %v8285_v18 = vsub.f32 %v469_v41, %v8265_v56  ;;  %v607_v38 = vand.u32 4294901760, %v8260_v49 }
  0xba   : > { %1097 = vmatpush1.msra.mxu1 %v8262_v52  ;;  %7108 = vmatprep.subr.bf16.mxu0 %v7107_v1  ;;  %v1211_v43 = vsub.f32 %v8209_v5, %v1210_v12  ;;  %v601_v42 = vand.u32 4294901760, %v8277_v10  ;;  %v1222_v21 = vand.u32 4294901760, %v8273_v62  ;;  %v567_v44 = vsub.f32 %v8193_v48, %v8205_v0 }
  0xbb   : > { %1162 = vmatmul.mubr.f32.vlgmr.msra.gmra.mrb[0].mxu1 %v8199_v60  ;;  %v7131_v22 = vpack.c.bf16 %v1206_v36, %v1194_v14  ;;  %7110 = vmatpush1.bf16.msra.mxu0 %v7109_v59  ;;  %v1200_v23 = vand.u32 4294901760, %v1199_v15  ;;  %v1216_v45 = vand.u32 4294901760, %v8285_v18  ;;  %v608_v46 = vsub.f32 %v8260_v49, %v607_v38 }
  0xbc   : > { %v1212_v26 = vand.u32 4294901760, %v1211_v43  ;;  %552 = vmatprep.mubr.f32.mxu0 %v7967_v6  ;;  %1167 = vmatprep.mubr.f32.mxu1 %v7967_v6  ;;  %v602_v27 = vsub.f32 %v8277_v10, %v601_v42  ;;  %v1223_v60 = vsub.f32 %v8273_v62, %v1222_v21  ;;  %v568_v41 = vand.u32 4294901760, %v567_v44  ;;  %v7034_v44 = vld [vmem:[%s9724_s2 + $0xa8] sm:$0xf] }
  0xbd   : > { %7132 = vmatprep.subr.bf16.mxu1 %v7131_v22  ;;  %558 = vmatmul.mubr.f32.gmra.mrb[2].mxu0 %v8202_v63  ;;  %v1217_v29 = vsub.f32 %v8285_v18, %v1216_v45  ;;  %v609_v31 = vand.u32 4294901760, %v608_v46  ;;  %v7111_v59 = vpack.c.bf16 %v8197_v58, %v8221_v17  ;;  %v7135_v1 = vpack.c.bf16 %v8207_v2, %v8235_v33 }
  0xbe   : > { %v7133_v36 = vpack.c.bf16 %v1212_v26, %v1200_v23  ;;  %v603_v37 = vand.u32 4294901760, %v602_v27  ;;  %563 = vmatprep.mubr.f32.mxu0 %v7967_v6  ;;  %v1224_v57 = vand.u32 4294901760, %v1223_v60  ;;  %v7137_v14 = vpack.c.bf16 %v8209_v5, %v8228_v39  ;;  %v7028_v5 = vld [vmem:[%s9724_s2 + $0x78] sm:$0xff] }
  0xbf   : > { %1173 = vmatmul.mubr.f32.gmra.mrb[2].mxu1 %v8202_v63  ;;  %v1218_v53 = vand.u32 4294901760, %v1217_v29  ;;  %v7113_v63 = vpack.c.bf16 %v8195_v54, %v8214_v13  ;;  %v7119_v15 = vpack.c.bf16 %v589_v9, %v577_v34  ;;  %v7145_v58 = vpack.c.bf16 %v1210_v12, %v1198_v61  ;;  %v7027_v54 = vld [vmem:[%s9724_s2 + $0x70] sm:$0xff]  ;;  %v7036_v23 = vld [vmem:[%s9724_s2 + $0xb8] sm:$0xf] }
  0xc0   : > { %7134 = vmatpush1.bf16.msra.mxu1 %v7133_v36  ;;  %604 = vmatprep.subr.mxu0 %v603_v37  ;;  %v7031_v34 = vld [vmem:[%s9724_s2 + $0x90] sm:$0xff] }
  0xc1   : > { %1219 = vmatprep.subr.mxu1 %v1218_v53  ;;  %610 = vmatpush1.msra.mxu0 %v609_v31 }
  0xc2   : > { %1178 = vmatprep.mubr.f32.mxu1 %v7967_v6  ;;  %569 = vmatmul.mubr.f32.gmra.mrb[4].mxu0 %v568_v41 }
  0xc3   : > { %7112 = vmatprep.subr.bf16.mxu0 %v7111_v59  ;;  %1184 = vmatmul.mubr.f32.gmra.mrb[4].mxu1 %v568_v41 }
  0xc4   : > { %1225 = vmatpush1.msra.mxu1 %v1224_v57  ;;  %669 = vmatprep.mubr.f32.mxu0 %v7967_v6 }
  0xc5   : > { %7136 = vmatprep.subr.bf16.mxu1 %v7135_v1  ;;  %1284 = vmatprep.mubr.f32.mxu1 %v7967_v6 }
  0xc6   : > { %671 = vmatmul.mubr.f32.vlgmr.msra.gmra.mrb[0].mxu0 %v8075_v35 }
  0xc7   : > { %7114 = vmatpush1.bf16.msra.mxu0 %v7113_v63  ;;  %1286 = vmatmul.mubr.f32.vlgmr.msra.gmra.mrb[0].mxu1 %v8075_v35 }
  0xc8   : > { %7138 = vmatpush1.bf16.msra.mxu1 %v7137_v14  ;;  %705 = vmatprep.subr.mxu0 %v8277_v10 }
  0xc9   : > { %1320 = vmatprep.subr.mxu1 %v8285_v18  ;;  %676 = vmatprep.mubr.f32.mxu0 %v7967_v6 }
  0xca   : > { %1291 = vmatprep.mubr.f32.mxu1 %v7967_v6  ;;  %678 = vmatmul.mubr.f32.gmra.mrb[2].mxu0 %v8101_v51 }
  0xcb   : > { %708 = vmatpush1.msra.mxu0 %v8260_v49  ;;  %1293 = vmatmul.mubr.f32.gmra.mrb[2].mxu1 %v8101_v51 }
  0xcc   : > { %1323 = vmatpush1.msra.mxu1 %v8273_v62  ;;  %7116 = vmatprep.subr.bf16.mxu0 %v8219_v16 }
  0xcd   : > { %7140 = vmatprep.subr.bf16.mxu1 %v8233_v32  ;;  %683 = vmatprep.mubr.f32.mxu0 %v7967_v6 }
  0xce   : > { %1298 = vmatprep.mubr.f32.mxu1 %v7967_v6  ;;  %685 = vmatmul.mubr.f32.gmra.mrb[4].mxu0 %v8186_v25 }
  0xcf   : > { %1300 = vmatmul.mubr.f32.gmra.mrb[4].mxu1 %v8186_v25  ;;  %767 = vmatprep.mubr.f32.mxu0 %v7967_v6 }
  0xd0   : > { %1382 = vmatprep.mubr.f32.mxu1 %v7967_v6 }
  0xd2   : > { %770 = vmatmul.mubr.f32.vlgmr.msra.gmra.mrb[0].mxu0 %v8099_v50 }
  0xd3   : > { %7118 = vmatpush1.bf16.msra.mxu0 %v8212_v11  ;;  %1385 = vmatmul.mubr.f32.vlgmr.msra.gmra.mrb[0].mxu1 %v8099_v50  ;;  %v7143_v50 = vpack.c.bf16 %v1204_v40, %v1192_v28 }
  0xd4   : > { %7142 = vmatpush1.bf16.msra.mxu1 %v8226_v19  ;;  %801 = vmatprep.subr.mxu0 %v8255_v30 }
  0xd5   : > { %1416 = vmatprep.subr.mxu1 %v8265_v56  ;;  %775 = vmatprep.mubr.f32.mxu0 %v7967_v6 }
  0xd6   : > { %1390 = vmatprep.mubr.f32.mxu1 %v7967_v6  ;;  %778 = vmatmul.mubr.f32.gmra.mrb[2].mxu0 %v8120_v4 }
  0xd7   : > { %803 = vmatpush1.msra.mxu0 %v8248_v47  ;;  %1393 = vmatmul.mubr.f32.gmra.mrb[2].mxu1 %v8120_v4  ;;  %v7121_v4 = vpack.c.bf16 %v595_v55, %v583_v20  ;;  %v7026_v55 = vld [vmem:[%s9724_s2 + $0x68] sm:$0xff]  ;;  %v7029_v20 = vld [vmem:[%s9724_s2 + $0x80] sm:$0xff] }
  0xd8   : > { %1418 = vmatpush1.msra.mxu1 %v8262_v52  ;;  %7120 = vmatprep.subr.bf16.mxu0 %v7119_v15 }
  0xd9   : > { %7144 = vmatprep.subr.bf16.mxu1 %v7143_v50  ;;  %783 = vmatprep.mubr.f32.mxu0 %v7967_v6 }
  0xda   : > { %1398 = vmatprep.mubr.f32.mxu1 %v7967_v6  ;;  %786 = vmatmul.mubr.f32.gmra.mrb[4].mxu0 %v8193_v48 }
  0xdb   : > { %1401 = vmatmul.mubr.f32.gmra.mrb[4].mxu1 %v8193_v48  ;;  %862 = vmatprep.mubr.f32.mxu0 %v7967_v6 }
  0xdc   : > { %1477 = vmatprep.mubr.f32.mxu1 %v7967_v6 }
  0xde   : > { %866 = vmatmul.mubr.f32.vlgmr.msra.gmra.mrb[0].mxu0 %v8117_v3 }
  0xdf   : > { %7122 = vmatpush1.bf16.msra.mxu0 %v7121_v4  ;;  %1481 = vmatmul.mubr.f32.vlgmr.msra.gmra.mrb[0].mxu1 %v8117_v3  ;;  %v7039_v3 = vld [vmem:[%s9723_s1 + $0x40] sm:$0xf] }
  0xe0   : > { %7146 = vmatpush1.bf16.msra.mxu1 %v7145_v58  ;;  %909 = vmatprep.subr.mxu0 %v601_v42 }
  0xe1   : > { %1524 = vmatprep.subr.mxu1 %v1216_v45  ;;  %871 = vmatprep.mubr.f32.mxu0 %v7967_v6 }
  0xe2   : > { %1486 = vmatprep.mubr.f32.mxu1 %v7967_v6  ;;  %875 = vmatmul.mubr.f32.gmra.mrb[2].mxu0 %v8184_v24 }
  0xe3   : > { %913 = vmatpush1.msra.mxu0 %v607_v38  ;;  %1490 = vmatmul.mubr.f32.gmra.mrb[2].mxu1 %v8184_v24  ;;  %v7025_v24 = vld [vmem:[%s9724_s2 + $0x60] sm:$0xff] }
  0xe4   : > { %1528 = vmatpush1.msra.mxu1 %v1222_v21  ;;  %7124 = vmatprep.subr.bf16.mxu0 %v8219_v16  ;;  %v7033_v38 = vld [vmem:[%s9724_s2 + $0xa0] sm:$0xf]  ;;  %v7035_v21 = vld [vmem:[%s9724_s2 + $0xb0] sm:$0xf] }
  0xe5   : > { %7148 = vmatprep.subr.bf16.mxu1 %v8233_v32  ;;  %880 = vmatprep.mubr.f32.mxu0 %v7967_v6 }
  0xe6   : > { %1495 = vmatprep.mubr.f32.mxu1 %v7967_v6  ;;  %884 = vmatmul.mubr.f32.gmra.mrb[4].mxu0 %v8205_v0 }
  0xe7   : > { %1499 = vmatmul.mubr.f32.gmra.mrb[4].mxu1 %v8205_v0  ;;  %972 = vmatprep.mubr.f32.mxu0 %v7967_v6  ;;  %v1737_v0 = vsel %vm448_vm0, %v7039_v3, 0 }
  0xe8   : > { %1587 = vmatprep.mubr.f32.mxu1 %v7967_v6  ;;  %v8461_v32 = vand.u32 4294901760, %v1737_v0 }
  0xea   : > { %974 = vmatmul.mubr.f32.vlgmr.msra.gmra.mrb[0].mxu0 %v8075_v35  ;;  %v8482_v43 = vsub.f32 %v1737_v0, %v8461_v32 }
  0xeb   : > { %7126 = vmatpush1.bf16.msra.mxu0 %v8212_v11  ;;  %1589 = vmatmul.mubr.f32.vlgmr.msra.gmra.mrb[0].mxu1 %v8075_v35 }
  0xec   : > { %7150 = vmatpush1.bf16.msra.mxu1 %v8226_v19  ;;  %1003 = vmatprep.subr.mxu0 %v8255_v30  ;;  %v7032_v30 = vld [vmem:[%s9724_s2 + $0x98] sm:$0xff]  ;;  %v8500_v37 = vand.u32 4294901760, %v8482_v43 }
  0xed   : > { %1618 = vmatprep.subr.mxu1 %v8265_v56  ;;  %979 = vmatprep.mubr.f32.mxu0 %v7967_v6 }
  0xee   : > { %1594 = vmatprep.mubr.f32.mxu1 %v7967_v6  ;;  %981 = vmatmul.mubr.f32.gmra.mrb[2].mxu0 %v8101_v51  ;;  %v1847_v14 = vsub.f32 %v8482_v43, %v8500_v37 }
  0xef   : > { %1005 = vmatpush1.msra.mxu0 %v8248_v47  ;;  %1596 = vmatmul.mubr.f32.gmra.mrb[2].mxu1 %v8101_v51  ;;  %v7030_v47 = vld [vmem:[%s9724_s2 + $0x88] sm:$0xff] }
  0xf0   : > { %1620 = vmatpush1.msra.mxu1 %v8262_v52  ;;  %986 = vmatprep.mubr.f32.mxu0 %v7967_v6 }
  0xf1   : > { %1601 = vmatprep.mubr.f32.mxu1 %v7967_v6 }
  0xf2   : > { %988 = vmatmul.mubr.f32.gmra.mrb[4].mxu0 %v8186_v25 }
  0xf3   : > { %1603 = vmatmul.mubr.f32.gmra.mrb[4].mxu1 %v8186_v25  ;;  %1064 = vmatprep.mubr.f32.mxu0 %v7967_v6 }
  0xf4   : > { %1679 = vmatprep.mubr.f32.mxu1 %v7967_v6 }
  0xf6   : > { %1066 = vmatmul.mubr.f32.vlgmr.msra.gmra.mrb[0].mxu0 %v8075_v35 }
  0xf7   : > { %1681 = vmatmul.mubr.f32.vlgmr.msra.gmra.mrb[0].mxu1 %v8075_v35  ;;  %1071 = vmatprep.mubr.f32.mxu0 %v7967_v6  ;;  %v7037_v35 = vld [vmem:[%s9723_s1 + $0x30] sm:$0xff] }
  0xf8   : > { %1686 = vmatprep.mubr.f32.mxu1 %v7967_v6 }
  0xfa   : > { %1073 = vmatmul.mubr.f32.gmra.mrb[2].mxu0 %v8101_v51 }
  0xfb   : > { %1688 = vmatmul.mubr.f32.gmra.mrb[2].mxu1 %v8101_v51  ;;  %1078 = vmatprep.mubr.f32.mxu0 %v7967_v6  ;;  %v7038_v51 = vld [vmem:[%s9723_s1 + $0x38] sm:$0xff] }
  0xfc   : > { %1693 = vmatprep.mubr.f32.mxu1 %v7967_v6  ;;  %v1734_v48 = vsel %vm448_vm0, %v7038_v51, 0 }
  0xfd   : > { %v8456_v17 = vand.u32 4294901760, %v1734_v48 }
  0xfe   : > { %1080 = vmatmul.mubr.f32.gmra.mrb[4].mxu0 %v8186_v25 }
  0xff   : > { %1695 = vmatmul.mubr.f32.gmra.mrb[4].mxu1 %v8186_v25  ;;  %1821 = vmatprep.mubr.f32.mxu0 %v7967_v6  ;;  %v1731_v25 = vsel %vm448_vm0, %v7037_v35, 0  ;;  %v8476_v62 = vsub.f32 %v1734_v48, %v8456_v17 }
 0x100   : > { %2436 = vmatprep.mubr.f32.mxu1 %v7967_v6  ;;  %v8454_v16 = vand.u32 4294901760, %v1731_v25 }
 0x101   : > { %v8497_v60 = vand.u32 4294901760, %v8476_v62 }
 0x102   : > { %v8473_v61 = vsub.f32 %v1731_v25, %v8454_v16 }
 0x103   : > { %v1836_v63 = vsub.f32 %v8476_v62, %v8497_v60 }
 0x104   : > { %v8494_v27 = vand.u32 4294901760, %v8473_v61 }
 0x105   : > { %v8516_v0 = vand.u32 4294901760, %v1836_v63 }
 0x106   : > { %v1825_v57 = vsub.f32 %v8473_v61, %v8494_v27 }
 0x108   : > { %v8512_v25 = vand.u32 4294901760, %v1825_v57 }
 0x1c9   : > { %v1067_v2 = vpop.f32.mrb[0].mxu0 }
 0x1ca   : > { %v7343_v9 = vadd.f32 %v7025_v24, %v1067_v2  ;;  %v1682_v11 = vpop.f32.mrb[0].mxu1  ;;  %v1069_v13 = vpop.f32.mrb[1].mxu0  ;;  %v8518_v2 = vand.u32 4294901760, %v1847_v14 }
 0x1cb   : > { %v7349_v19 = vadd.f32 %v7027_v54, %v1682_v11  ;;  %v7344_v39 = vadd.f32 %v7026_v55, %v1069_v13  ;;  %v1684_v40 = vpop.f32.mrb[1].mxu1 }
 0x1cc   : > { %7780 = vtanh.f32 %v7343_v9  ;;  %v7350_v33 = vadd.f32 %v7028_v5, %v1684_v40 }
 0x1cd   : > { %7782 = vtanh.f32 %v7349_v19  ;;  %v1074_v28 = vpop.f32.mrb[2].mxu0 }
 0x1ce   : > { %7784 = vtanh.f32 %v7344_v39  ;;  %v7345_v49 = vadd.f32 %v7029_v20, %v1074_v28  ;;  %v1689_v52 = vpop.f32.mrb[2].mxu1  ;;  %v1076_v56 = vpop.f32.mrb[3].mxu0 }
 0x1cf   : > { %7786 = vtanh.f32 %v7350_v33  ;;  %v7351_v12 = vadd.f32 %v7031_v34, %v1689_v52  ;;  %v7346_v10 = vadd.f32 %v7030_v47, %v1076_v56  ;;  %v1691_v18 = vpop.f32.mrb[3].mxu1 }
 0x1d0   : > { %7788 = vtanh.f32 %v7345_v49  ;;  %v7352_v42 = vadd.f32 %v7032_v30, %v1691_v18 }
 0x1d1   : > { %7790 = vtanh.f32 %v7351_v12  ;;  %v1081_v22 = vpop.f32.mrb[4].mxu0 }
 0x1d2   : > { %7792 = vtanh.f32 %v7346_v10  ;;  %v7347_v45 = vadd.f32 %v7033_v38, %v1081_v22  ;;  %v1696_v46 = vpop.f32.mrb[4].mxu1  ;;  %v1083_v26 = vpop.f32.mrb[5].mxu0 }
 0x1d3   : > { %7794 = vtanh.f32 %v7352_v42  ;;  %v7353_v29 = vadd.f32 %v7035_v21, %v1696_v46  ;;  %v7348_v31 = vadd.f32 %v7034_v44, %v1083_v26  ;;  %v1698_v36 = vpop.f32.mrb[5].mxu1 }
 0x1d4   : > { %7796 = vtanh.f32 %v7347_v45  ;;  %v7354_v41 = vadd.f32 %v7036_v23, %v1698_v36 }
 0x1d5   : > { %7798 = vtanh.f32 %v7353_v29 }
 0x1d6   : > { %v7781_v53 = vpop.eup %7780  ;;  %7800 = vtanh.f32 %v7348_v31 }
 0x1d7   : > { %v7783_v59 = vpop.eup %7782  ;;  %7802 = vtanh.f32 %v7354_v41  ;;  %v1753_v1 = vand.u32 4294901760, %v7781_v53 }
 0x1d8   : > { %v7785_v15 = vpop.eup %7784  ;;  %v2368_v50 = vand.u32 4294901760, %v7783_v59 }
 0x1d9   : > { %v7787_v4 = vpop.eup %7786  ;;  %v1751_v58 = vand.u32 4294901760, %v7785_v15  ;;  %v8508_v35 = vsub.f32 %v7781_v53, %v1753_v1 }
 0x1da   : > { %v7789_v51 = vpop.eup %7788  ;;  %v2366_v3 = vand.u32 4294901760, %v7787_v4  ;;  %v8510_v24 = vsub.f32 %v7783_v59, %v2368_v50 }
 0x1db   : > { %v7791_v48 = vpop.eup %7790  ;;  %v8514_v54 = vsub.f32 %v7785_v15, %v1751_v58  ;;  %v1757_v55 = vand.u32 4294901760, %v7789_v51  ;;  %v1863_v13 = vand.u32 4294901760, %v8508_v35 }
 0x1dc   : > { %v7793_v5 = vpop.eup %7792  ;;  %v8520_v9 = vsub.f32 %v7787_v4, %v2366_v3  ;;  %v2372_v11 = vand.u32 4294901760, %v7791_v48  ;;  %v2478_v19 = vand.u32 4294901760, %v8510_v24 }
 0x1dd   : > { %v7795_v39 = vpop.eup %7794  ;;  %v1755_v40 = vand.u32 4294901760, %v7793_v5  ;;  %v8524_v20 = vpack.c.bf16 %v1757_v55, %v1753_v1  ;;  %v8526_v33 = vsub.f32 %v7789_v51, %v1757_v55  ;;  %v1857_v34 = vand.u32 4294901760, %v8514_v54 }
 0x1de   : > { %v7797_v47 = vpop.eup %7796  ;;  %v2370_v28 = vand.u32 4294901760, %v7795_v39  ;;  %v8529_v30 = vpack.c.bf16 %v2372_v11, %v2368_v50  ;;  %v8531_v49 = vsub.f32 %v7791_v48, %v2372_v11  ;;  %v2472_v52 = vand.u32 4294901760, %v8520_v9 }
 0x1df   : > { %v7799_v56 = vpop.eup %7798  ;;  %v8534_v12 = vpack.c.bf16 %v1755_v40, %v1751_v58  ;;  %v8536_v10 = vsub.f32 %v7793_v5, %v1755_v40  ;;  %v1740_v18 = vsel %vm458_vm1, %v7797_v47, 0  ;;  %v1858_v38 = vsub.f32 %v8514_v54, %v1857_v34 }
 0x1e0   : > { %v7801_v42 = vpop.eup %7800  ;;  %v8542_v21 = vpack.c.bf16 %v2370_v28, %v2366_v3  ;;  %v8544_v44 = vsub.f32 %v7795_v39, %v2370_v28  ;;  %v8546_v22 = vand.u32 4294901760, %v1740_v18  ;;  %v1746_v23 = vsel %vm458_vm1, %v7799_v56, 0 }
 0x1e1   : > { %v7803_v45 = vpop.eup %7802  ;;  %7152 = vmatprep.subr.bf16.mxu0 %v8534_v12  ;;  %v1743_v46 = vsel %vm458_vm1, %v7801_v42, 0  ;;  %v8551_v26 = vand.u32 4294901760, %v1746_v23  ;;  %v1859_v29 = vand.u32 4294901760, %v1858_v38  ;;  %v1869_v31 = vand.u32 4294901760, %v8536_v10 }
 0x1e2   : > { %7176 = vmatprep.subr.bf16.mxu1 %v8542_v21  ;;  %7154 = vmatpush1.bf16.msra.mxu0 %v8524_v20  ;;  %v8556_v36 = vand.u32 4294901760, %v1743_v46  ;;  %v1749_v41 = vsel %vm458_vm1, %v7803_v45, 0  ;;  %v8560_v53 = vsub.f32 %v1740_v18, %v8546_v22  ;;  %v2473_v57 = vsub.f32 %v8520_v9, %v2472_v52 }
 0x1e3   : > { %7178 = vmatpush1.bf16.msra.mxu1 %v8529_v30  ;;  %v8566_v59 = vand.u32 4294901760, %v1749_v41  ;;  %v8569_v1 = vsub.f32 %v1746_v23, %v8551_v26  ;;  %v1870_v63 = vsub.f32 %v8536_v10, %v1869_v31  ;;  %v2484_v14 = vand.u32 4294901760, %v8544_v44 }
 0x1e4   : > { %1760 = vmatprep.subr.mxu0 %v8556_v36  ;;  %v2474_v15 = vand.u32 4294901760, %v2473_v57  ;;  %v1864_v50 = vsub.f32 %v8508_v35, %v1863_v13  ;;  %v1875_v4 = vand.u32 4294901760, %v8526_v33  ;;  %v2479_v58 = vsub.f32 %v8510_v24, %v2478_v19 }
 0x1e5   : > { %2375 = vmatprep.subr.mxu1 %v8566_v59  ;;  %v1871_v51 = vand.u32 4294901760, %v1870_v63  ;;  %v2485_v3 = vsub.f32 %v8544_v44, %v2484_v14  ;;  %v2490_v48 = vand.u32 4294901760, %v8531_v49  ;;  %v8585_v55 = vsub.f32 %v1743_v46, %v8556_v36 }
 0x1e6   : > { %1762 = vmatpush1.msra.mxu0 %v8546_v22  ;;  %v1865_v5 = vand.u32 4294901760, %v1864_v50  ;;  %v1876_v11 = vsub.f32 %v8526_v33, %v1875_v4  ;;  %v2480_v39 = vand.u32 4294901760, %v2479_v58  ;;  %v8590_v40 = vsub.f32 %v1749_v41, %v8566_v59 }
 0x1e7   : > { %2377 = vmatpush1.msra.mxu1 %v8551_v26  ;;  %1827 = vmatmul.mubr.f32.vlgmr.msra.gmra.mrb[6].mxu0 %v8512_v25  ;;  %v7155_v47 = vpack.c.bf16 %v1871_v51, %v1859_v29  ;;  %v2486_v28 = vand.u32 4294901760, %v2485_v3  ;;  %v2491_v56 = vsub.f32 %v8531_v49, %v2490_v48  ;;  %v1881_v18 = vand.u32 4294901760, %v8585_v55 }
 0x1e8   : > { %2442 = vmatmul.mubr.f32.vlgmr.msra.gmra.mrb[6].mxu1 %v8512_v25  ;;  %1832 = vmatprep.mubr.f32.mxu0 %v7967_v6  ;;  %v1877_v38 = vand.u32 4294901760, %v1876_v11  ;;  %v2496_v42 = vand.u32 4294901760, %v8590_v40  ;;  %v1887_v23 = vand.u32 4294901760, %v8560_v53  ;;  %v2502_v45 = vand.u32 4294901760, %v8569_v1 }
 0x1e9   : > { %7156 = vmatprep.subr.bf16.mxu0 %v7155_v47  ;;  %v7179_v46 = vpack.c.bf16 %v2486_v28, %v2474_v15  ;;  %2447 = vmatprep.mubr.f32.mxu1 %v7967_v6  ;;  %v2492_v29 = vand.u32 4294901760, %v2491_v56  ;;  %v1882_v41 = vsub.f32 %v8585_v55, %v1881_v18  ;;  %v7159_v25 = vpack.c.bf16 %v8536_v10, %v8514_v54  ;;  %v7048_v28 = vld [vmem:[%s9724_s2 + $0x100] sm:$0xf] }
 0x1ea   : > { %v7157_v57 = vpack.c.bf16 %v1877_v38, %v1865_v5  ;;  %v2497_v63 = vsub.f32 %v8590_v40, %v2496_v42  ;;  %v1888_v50 = vsub.f32 %v8560_v53, %v1887_v23  ;;  %v2503_v15 = vsub.f32 %v8569_v1, %v2502_v45  ;;  %v7050_v38 = vld [vmem:[%s9724_s2 + $0x110] sm:$0xf] }
 0x1eb   : > { %7180 = vmatprep.subr.bf16.mxu1 %v7179_v46  ;;  %v7181_v58 = vpack.c.bf16 %v2492_v29, %v2480_v39  ;;  %1838 = vmatmul.mubr.f32.gmra.mrb[8].mxu0 %v8516_v0  ;;  %v1883_v51 = vand.u32 4294901760, %v1882_v41  ;;  %v7183_v10 = vpack.c.bf16 %v8544_v44, %v8520_v9  ;;  %v7161_v3 = vpack.c.bf16 %v8526_v33, %v8508_v35 }
 0x1ec   : > { %7158 = vmatpush1.bf16.msra.mxu0 %v7157_v57  ;;  %2453 = vmatmul.mubr.f32.gmra.mrb[8].mxu1 %v8516_v0  ;;  %v2498_v5 = vand.u32 4294901760, %v2497_v63  ;;  %v7185_v11 = vpack.c.bf16 %v8531_v49, %v8510_v24  ;;  %v7167_v39 = vpack.c.bf16 %v1869_v31, %v1857_v34  ;;  %v7191_v47 = vpack.c.bf16 %v2484_v14, %v2472_v52  ;;  %v7043_v24 = vld [vmem:[%s9724_s2 + $0xd8] sm:$0xff]  ;;  %v7044_v52 = vld [vmem:[%s9724_s2 + $0xe0] sm:$0xff] }
 0x1ed   : > { %7182 = vmatpush1.bf16.msra.mxu1 %v7181_v58  ;;  %1884 = vmatprep.subr.mxu0 %v1883_v51  ;;  %v7169_v44 = vpack.c.bf16 %v1875_v4, %v1863_v13  ;;  %v1889_v33 = vand.u32 4294901760, %v1888_v50  ;;  %v7193_v0 = vpack.c.bf16 %v2490_v48, %v2478_v19  ;;  %v2504_v49 = vand.u32 4294901760, %v2503_v15 }
 0x1ee   : > { %2499 = vmatprep.subr.mxu1 %v2498_v5  ;;  %1843 = vmatprep.mubr.f32.mxu0 %v7967_v6 }
 0x1ef   : > { %2458 = vmatprep.mubr.f32.mxu1 %v7967_v6  ;;  %1849 = vmatmul.mubr.f32.gmra.mrb[10].mxu0 %v8518_v2 }
 0x1f0   : > { %1890 = vmatpush1.msra.mxu0 %v1889_v33  ;;  %2464 = vmatmul.mubr.f32.gmra.mrb[10].mxu1 %v8518_v2 }
 0x1f1   : > { %2505 = vmatpush1.msra.mxu1 %v2504_v49  ;;  %7160 = vmatprep.subr.bf16.mxu0 %v7159_v25 }
 0x1f2   : > { %7184 = vmatprep.subr.bf16.mxu1 %v7183_v10  ;;  %1949 = vmatprep.mubr.f32.mxu0 %v7967_v6 }
 0x1f3   : > { %2564 = vmatprep.mubr.f32.mxu1 %v7967_v6  ;;  %1951 = vmatmul.mubr.f32.vlgmr.msra.gmra.mrb[6].mxu0 %v8454_v16 }
 0x1f4   : > { %7162 = vmatpush1.bf16.msra.mxu0 %v7161_v3  ;;  %2566 = vmatmul.mubr.f32.vlgmr.msra.gmra.mrb[6].mxu1 %v8454_v16 }
 0x1f5   : > { %7186 = vmatpush1.bf16.msra.mxu1 %v7185_v11  ;;  %1985 = vmatprep.subr.mxu0 %v8585_v55 }
 0x1f6   : > { %2600 = vmatprep.subr.mxu1 %v8590_v40  ;;  %1956 = vmatprep.mubr.f32.mxu0 %v7967_v6 }
 0x1f7   : > { %2571 = vmatprep.mubr.f32.mxu1 %v7967_v6  ;;  %1958 = vmatmul.mubr.f32.gmra.mrb[8].mxu0 %v8456_v17 }
 0x1f8   : > { %1988 = vmatpush1.msra.mxu0 %v8560_v53  ;;  %2573 = vmatmul.mubr.f32.gmra.mrb[8].mxu1 %v8456_v17 }
 0x1f9   : > { %2603 = vmatpush1.msra.mxu1 %v8569_v1  ;;  %7164 = vmatprep.subr.bf16.mxu0 %v8534_v12 }
 0x1fa   : > { %7188 = vmatprep.subr.bf16.mxu1 %v8542_v21  ;;  %1963 = vmatprep.mubr.f32.mxu0 %v7967_v6 }
 0x1fb   : > { %2578 = vmatprep.mubr.f32.mxu1 %v7967_v6  ;;  %1965 = vmatmul.mubr.f32.gmra.mrb[10].mxu0 %v8461_v32 }
 0x1fc   : > { %2580 = vmatmul.mubr.f32.gmra.mrb[10].mxu1 %v8461_v32  ;;  %2047 = vmatprep.mubr.f32.mxu0 %v7967_v6 }
 0x1fd   : > { %2662 = vmatprep.mubr.f32.mxu1 %v7967_v6 }
 0x1ff   : > { %2050 = vmatmul.mubr.f32.vlgmr.msra.gmra.mrb[6].mxu0 %v8473_v61 }
 0x200   : > { %7166 = vmatpush1.bf16.msra.mxu0 %v8524_v20  ;;  %2665 = vmatmul.mubr.f32.vlgmr.msra.gmra.mrb[6].mxu1 %v8473_v61  ;;  %v7054_v61 = vld [vmem:[%s9723_s1 + $0x58] sm:$0xf] }
 0x201   : > { %7190 = vmatpush1.bf16.msra.mxu1 %v8529_v30  ;;  %2081 = vmatprep.subr.mxu0 %v8556_v36 }
 0x202   : > { %2696 = vmatprep.subr.mxu1 %v8566_v59  ;;  %2055 = vmatprep.mubr.f32.mxu0 %v7967_v6 }
 0x203   : > { %2670 = vmatprep.mubr.f32.mxu1 %v7967_v6  ;;  %2058 = vmatmul.mubr.f32.gmra.mrb[8].mxu0 %v8476_v62 }
 0x204   : > { %2083 = vmatpush1.msra.mxu0 %v8546_v22  ;;  %2673 = vmatmul.mubr.f32.gmra.mrb[8].mxu1 %v8476_v62 }
 0x205   : > { %2698 = vmatpush1.msra.mxu1 %v8551_v26  ;;  %7168 = vmatprep.subr.bf16.mxu0 %v7167_v39 }
 0x206   : > { %7192 = vmatprep.subr.bf16.mxu1 %v7191_v47  ;;  %2063 = vmatprep.mubr.f32.mxu0 %v7967_v6 }
 0x207   : > { %2678 = vmatprep.mubr.f32.mxu1 %v7967_v6  ;;  %2066 = vmatmul.mubr.f32.gmra.mrb[10].mxu0 %v8482_v43 }
 0x208   : > { %2681 = vmatmul.mubr.f32.gmra.mrb[10].mxu1 %v8482_v43  ;;  %2142 = vmatprep.mubr.f32.mxu0 %v7967_v6 }
 0x209   : > { %2757 = vmatprep.mubr.f32.mxu1 %v7967_v6 }
 0x20b   : > { %2146 = vmatmul.mubr.f32.vlgmr.msra.gmra.mrb[6].mxu0 %v8494_v27 }
 0x20c   : > { %7170 = vmatpush1.bf16.msra.mxu0 %v7169_v44  ;;  %2761 = vmatmul.mubr.f32.vlgmr.msra.gmra.mrb[6].mxu1 %v8494_v27  ;;  %v7042_v27 = vld [vmem:[%s9724_s2 + $0xd0] sm:$0xff] }
 0x20d   : > { %7194 = vmatpush1.bf16.msra.mxu1 %v7193_v0  ;;  %2189 = vmatprep.subr.mxu0 %v1881_v18 }
 0x20e   : > { %2804 = vmatprep.subr.mxu1 %v2496_v42  ;;  %2151 = vmatprep.mubr.f32.mxu0 %v7967_v6  ;;  %v7049_v42 = vld [vmem:[%s9724_s2 + $0x108] sm:$0xf] }
 0x20f   : > { %2766 = vmatprep.mubr.f32.mxu1 %v7967_v6  ;;  %2155 = vmatmul.mubr.f32.gmra.mrb[8].mxu0 %v8497_v60 }
 0x210   : > { %2193 = vmatpush1.msra.mxu0 %v1887_v23  ;;  %2770 = vmatmul.mubr.f32.gmra.mrb[8].mxu1 %v8497_v60  ;;  %v7041_v60 = vld [vmem:[%s9724_s2 + $0xc8] sm:$0xff] }
 0x211   : > { %2808 = vmatpush1.msra.mxu1 %v2502_v45  ;;  %7172 = vmatprep.subr.bf16.mxu0 %v8534_v12  ;;  %v7051_v45 = vld [vmem:[%s9724_s2 + $0x118] sm:$0xf] }
 0x212   : > { %7196 = vmatprep.subr.bf16.mxu1 %v8542_v21  ;;  %2160 = vmatprep.mubr.f32.mxu0 %v7967_v6 }
 0x213   : > { %2775 = vmatprep.mubr.f32.mxu1 %v7967_v6  ;;  %2164 = vmatmul.mubr.f32.gmra.mrb[10].mxu0 %v8500_v37 }
 0x214   : > { %2779 = vmatmul.mubr.f32.gmra.mrb[10].mxu1 %v8500_v37  ;;  %2252 = vmatprep.mubr.f32.mxu0 %v7967_v6  ;;  %v3017_v37 = vsel %vm448_vm0, %v7054_v61, 0 }
 0x215   : > { %2867 = vmatprep.mubr.f32.mxu1 %v7967_v6  ;;  %v8757_v12 = vand.u32 4294901760, %v3017_v37 }
 0x217   : > { %2254 = vmatmul.mubr.f32.vlgmr.msra.gmra.mrb[6].mxu0 %v8454_v16  ;;  %v8778_v56 = vsub.f32 %v3017_v37, %v8757_v12 }
 0x218   : > { %7174 = vmatpush1.bf16.msra.mxu0 %v8524_v20  ;;  %2869 = vmatmul.mubr.f32.vlgmr.msra.gmra.mrb[6].mxu1 %v8454_v16 }
 0x219   : > { %7198 = vmatpush1.bf16.msra.mxu1 %v8529_v30  ;;  %2283 = vmatprep.subr.mxu0 %v8556_v36  ;;  %v7047_v36 = vld [vmem:[%s9724_s2 + $0xf8] sm:$0xff]  ;;  %v8796_v58 = vand.u32 4294901760, %v8778_v56 }
 0x21a   : > { %2898 = vmatprep.subr.mxu1 %v8566_v59  ;;  %2259 = vmatprep.mubr.f32.mxu0 %v7967_v6 }
 0x21b   : > { %2874 = vmatprep.mubr.f32.mxu1 %v7967_v6  ;;  %2261 = vmatmul.mubr.f32.gmra.mrb[8].mxu0 %v8456_v17  ;;  %v3127_v47 = vsub.f32 %v8778_v56, %v8796_v58 }
 0x21c   : > { %2285 = vmatpush1.msra.mxu0 %v8546_v22  ;;  %2876 = vmatmul.mubr.f32.gmra.mrb[8].mxu1 %v8456_v17  ;;  %v7046_v22 = vld [vmem:[%s9724_s2 + $0xf0] sm:$0xff] }
 0x21d   : > { %2900 = vmatpush1.msra.mxu1 %v8551_v26  ;;  %2266 = vmatprep.mubr.f32.mxu0 %v7967_v6  ;;  %v7045_v26 = vld [vmem:[%s9724_s2 + $0xe8] sm:$0xff] }
 0x21e   : > { %2881 = vmatprep.mubr.f32.mxu1 %v7967_v6 }
 0x21f   : > { %2268 = vmatmul.mubr.f32.gmra.mrb[10].mxu0 %v8461_v32 }
 0x220   : > { %2883 = vmatmul.mubr.f32.gmra.mrb[10].mxu1 %v8461_v32  ;;  %2344 = vmatprep.mubr.f32.mxu0 %v7967_v6 }
 0x221   : > { %2959 = vmatprep.mubr.f32.mxu1 %v7967_v6 }
 0x223   : > { %2346 = vmatmul.mubr.f32.vlgmr.msra.gmra.mrb[6].mxu0 %v8454_v16 }
 0x224   : > { %2961 = vmatmul.mubr.f32.vlgmr.msra.gmra.mrb[6].mxu1 %v8454_v16  ;;  %2351 = vmatprep.mubr.f32.mxu0 %v7967_v6  ;;  %v7052_v16 = vld [vmem:[%s9723_s1 + $0x48] sm:$0xff] }
 0x225   : > { %2966 = vmatprep.mubr.f32.mxu1 %v7967_v6  ;;  %v3011_v62 = vsel %vm448_vm0, %v7052_v16, 0 }
 0x226   : > { %v8750_v13 = vand.u32 4294901760, %v3011_v62 }
 0x227   : > { %2353 = vmatmul.mubr.f32.gmra.mrb[8].mxu0 %v8456_v17 }
 0x228   : > { %2968 = vmatmul.mubr.f32.gmra.mrb[8].mxu1 %v8456_v17  ;;  %2358 = vmatprep.mubr.f32.mxu0 %v7967_v6  ;;  %v7053_v17 = vld [vmem:[%s9723_s1 + $0x50] sm:$0xff]  ;;  %v8769_v14 = vsub.f32 %v3011_v62, %v8750_v13 }
 0x229   : > { %2973 = vmatprep.mubr.f32.mxu1 %v7967_v6  ;;  %v3014_v43 = vsel %vm448_vm0, %v7053_v17, 0 }
 0x22a   : > { %v8752_v19 = vand.u32 4294901760, %v3014_v43  ;;  %v8790_v25 = vand.u32 4294901760, %v8769_v14 }
 0x22b   : > { %2360 = vmatmul.mubr.f32.gmra.mrb[10].mxu0 %v8461_v32 }
 0x22c   : > { %2975 = vmatmul.mubr.f32.gmra.mrb[10].mxu1 %v8461_v32  ;;  %3101 = vmatprep.mubr.f32.mxu0 %v7967_v6  ;;  %v7040_v32 = vld [vmem:[%s9724_s2 + $0xc0] sm:$0xff]  ;;  %v8772_v4 = vsub.f32 %v3014_v43, %v8752_v19  ;;  %v3105_v3 = vsub.f32 %v8769_v14, %v8790_v25 }
 0x22d   : > { %3716 = vmatprep.mubr.f32.mxu1 %v7967_v6 }
 0x22e   : > { %v8793_v57 = vand.u32 4294901760, %v8772_v4  ;;  %v8808_v62 = vand.u32 4294901760, %v3105_v3 }
 0x230   : > { %v3116_v39 = vsub.f32 %v8772_v4, %v8793_v57 }
 0x232   : > { %v8812_v37 = vand.u32 4294901760, %v3116_v39 }
 0x2f6   : > { %v2347_v35 = vpop.f32.mrb[6].mxu0 }
 0x2f7   : > { %v7355_v54 = vadd.f32 %v7040_v32, %v2347_v35  ;;  %v2962_v2 = vpop.f32.mrb[6].mxu1  ;;  %v2349_v9 = vpop.f32.mrb[7].mxu0  ;;  %v8814_v35 = vand.u32 4294901760, %v3127_v47 }
 0x2f8   : > { %v7361_v20 = vadd.f32 %v7042_v27, %v2962_v2  ;;  %v7356_v34 = vadd.f32 %v7041_v60, %v2349_v9  ;;  %v2964_v30 = vpop.f32.mrb[7].mxu1 }
 0x2f9   : > { %7804 = vtanh.f32 %v7355_v54  ;;  %v7362_v21 = vadd.f32 %v7043_v24, %v2964_v30 }
 0x2fa   : > { %7806 = vtanh.f32 %v7361_v20  ;;  %v2354_v31 = vpop.f32.mrb[8].mxu0 }
 0x2fb   : > { %7808 = vtanh.f32 %v7356_v34  ;;  %v7357_v53 = vadd.f32 %v7044_v52, %v2354_v31  ;;  %v2969_v59 = vpop.f32.mrb[8].mxu1  ;;  %v2356_v1 = vpop.f32.mrb[9].mxu0 }
 0x2fc   : > { %7810 = vtanh.f32 %v7362_v21  ;;  %v7363_v48 = vadd.f32 %v7046_v22, %v2969_v59  ;;  %v7358_v55 = vadd.f32 %v7045_v26, %v2356_v1  ;;  %v2971_v40 = vpop.f32.mrb[9].mxu1 }
 0x2fd   : > { %7812 = vtanh.f32 %v7357_v53  ;;  %v7364_v18 = vadd.f32 %v7047_v36, %v2971_v40 }
 0x2fe   : > { %7814 = vtanh.f32 %v7363_v48  ;;  %v2361_v23 = vpop.f32.mrb[10].mxu0 }
 0x2ff   : > { %7816 = vtanh.f32 %v7358_v55  ;;  %v7359_v46 = vadd.f32 %v7048_v28, %v2361_v23  ;;  %v2976_v29 = vpop.f32.mrb[10].mxu1  ;;  %v2363_v41 = vpop.f32.mrb[11].mxu0 }
 0x300   : > { %7818 = vtanh.f32 %v7364_v18  ;;  %v7365_v63 = vadd.f32 %v7050_v38, %v2976_v29  ;;  %v7360_v50 = vadd.f32 %v7049_v42, %v2363_v41  ;;  %v2978_v15 = vpop.f32.mrb[11].mxu1 }
 0x301   : > { %7820 = vtanh.f32 %v7359_v46  ;;  %v7366_v51 = vadd.f32 %v7051_v45, %v2978_v15 }
 0x302   : > { %7822 = vtanh.f32 %v7365_v63 }
 0x303   : > { %v7805_v10 = vpop.eup %7804  ;;  %7824 = vtanh.f32 %v7360_v50 }
 0x304   : > { %v7807_v5 = vpop.eup %7806  ;;  %7826 = vtanh.f32 %v7366_v51  ;;  %v3033_v11 = vand.u32 4294901760, %v7805_v10 }
 0x305   : > { %v7809_v44 = vpop.eup %7808  ;;  %v3648_v33 = vand.u32 4294901760, %v7807_v5 }
 0x306   : > { %v7811_v0 = vpop.eup %7810  ;;  %v3031_v49 = vand.u32 4294901760, %v7809_v44  ;;  %v8804_v16 = vsub.f32 %v7805_v10, %v3033_v11 }
 0x307   : > { %v7813_v17 = vpop.eup %7812  ;;  %v3646_v61 = vand.u32 4294901760, %v7811_v0  ;;  %v8806_v32 = vsub.f32 %v7807_v5, %v3648_v33 }
 0x308   : > { %v7815_v43 = vpop.eup %7814  ;;  %v8810_v27 = vsub.f32 %v7809_v44, %v3031_v49  ;;  %v3037_v60 = vand.u32 4294901760, %v7813_v17  ;;  %v3143_v9 = vand.u32 4294901760, %v8804_v16 }
 0x309   : > { %v7817_v24 = vpop.eup %7816  ;;  %v8816_v54 = vsub.f32 %v7811_v0, %v3646_v61  ;;  %v3652_v2 = vand.u32 4294901760, %v7815_v43  ;;  %v3758_v20 = vand.u32 4294901760, %v8806_v32 }
 0x30a   : > { %v7819_v34 = vpop.eup %7818  ;;  %v3035_v30 = vand.u32 4294901760, %v7817_v24  ;;  %v8820_v52 = vpack.c.bf16 %v3037_v60, %v3033_v11  ;;  %v8822_v21 = vsub.f32 %v7813_v17, %v3037_v60  ;;  %v3137_v22 = vand.u32 4294901760, %v8810_v27 }
 0x30b   : > { %v7821_v26 = vpop.eup %7820  ;;  %v3650_v31 = vand.u32 4294901760, %v7819_v34  ;;  %v8825_v36 = vpack.c.bf16 %v3652_v2, %v3648_v33  ;;  %v8827_v53 = vsub.f32 %v7815_v43, %v3652_v2  ;;  %v3752_v59 = vand.u32 4294901760, %v8816_v54 }
 0x30c   : > { %v7823_v1 = vpop.eup %7822  ;;  %v8830_v48 = vpack.c.bf16 %v3035_v30, %v3031_v49  ;;  %v8832_v55 = vsub.f32 %v7817_v24, %v3035_v30  ;;  %v3020_v40 = vsel %vm458_vm1, %v7821_v26, 0  ;;  %v3138_v28 = vsub.f32 %v8810_v27, %v3137_v22 }
 0x30d   : > { %v7825_v18 = vpop.eup %7824  ;;  %v8838_v38 = vpack.c.bf16 %v3650_v31, %v3646_v61  ;;  %v8840_v42 = vsub.f32 %v7819_v34, %v3650_v31  ;;  %v8842_v23 = vand.u32 4294901760, %v3020_v40  ;;  %v3026_v45 = vsel %vm458_vm1, %v7823_v1, 0 }
 0x30e   : > { %v7827_v46 = vpop.eup %7826  ;;  %7200 = vmatprep.subr.bf16.mxu0 %v8830_v48  ;;  %v3023_v29 = vsel %vm458_vm1, %v7825_v18, 0  ;;  %v8847_v41 = vand.u32 4294901760, %v3026_v45  ;;  %v3139_v63 = vand.u32 4294901760, %v3138_v28  ;;  %v3149_v50 = vand.u32 4294901760, %v8832_v55 }
 0x30f   : > { %7224 = vmatprep.subr.bf16.mxu1 %v8838_v38  ;;  %7202 = vmatpush1.bf16.msra.mxu0 %v8820_v52  ;;  %v8852_v15 = vand.u32 4294901760, %v3023_v29  ;;  %v3029_v51 = vsel %vm458_vm1, %v7827_v46, 0  ;;  %v8856_v10 = vsub.f32 %v3020_v40, %v8842_v23  ;;  %v3753_v3 = vsub.f32 %v8816_v54, %v3752_v59 }
 0x310   : > { %7226 = vmatpush1.bf16.msra.mxu1 %v8825_v36  ;;  %v8862_v5 = vand.u32 4294901760, %v3029_v51  ;;  %v8865_v11 = vsub.f32 %v3026_v45, %v8847_v41  ;;  %v3150_v39 = vsub.f32 %v8832_v55, %v3149_v50  ;;  %v3764_v47 = vand.u32 4294901760, %v8840_v42 }
 0x311   : > { %3040 = vmatprep.subr.mxu0 %v8852_v15  ;;  %v3754_v44 = vand.u32 4294901760, %v3753_v3  ;;  %v3144_v33 = vsub.f32 %v8804_v16, %v3143_v9  ;;  %v3155_v0 = vand.u32 4294901760, %v8822_v21  ;;  %v3759_v49 = vsub.f32 %v8806_v32, %v3758_v20 }
 0x312   : > { %3655 = vmatprep.subr.mxu1 %v8862_v5  ;;  %v3151_v17 = vand.u32 4294901760, %v3150_v39  ;;  %v3765_v61 = vsub.f32 %v8840_v42, %v3764_v47  ;;  %v3770_v43 = vand.u32 4294901760, %v8827_v53  ;;  %v8881_v60 = vsub.f32 %v3023_v29, %v8852_v15 }
 0x313   : > { %3042 = vmatpush1.msra.mxu0 %v8842_v23  ;;  %v3145_v24 = vand.u32 4294901760, %v3144_v33  ;;  %v3156_v2 = vsub.f32 %v8822_v21, %v3155_v0  ;;  %v3760_v34 = vand.u32 4294901760, %v3759_v49  ;;  %v8886_v30 = vsub.f32 %v3029_v51, %v8862_v5 }
 0x314   : > { %3657 = vmatpush1.msra.mxu1 %v8847_v41  ;;  %3107 = vmatmul.mubr.f32.vlgmr.msra.gmra.mrb[12].mxu0 %v8808_v62  ;;  %v7203_v26 = vpack.c.bf16 %v3151_v17, %v3139_v63  ;;  %v3766_v31 = vand.u32 4294901760, %v3765_v61  ;;  %v3771_v1 = vsub.f32 %v8827_v53, %v3770_v43  ;;  %v3161_v40 = vand.u32 4294901760, %v8881_v60 }
 0x315   : > { %3722 = vmatmul.mubr.f32.vlgmr.msra.gmra.mrb[12].mxu1 %v8808_v62  ;;  %3112 = vmatprep.mubr.f32.mxu0 %v7967_v6  ;;  %v3157_v28 = vand.u32 4294901760, %v3156_v2  ;;  %v3776_v18 = vand.u32 4294901760, %v8886_v30  ;;  %v3167_v45 = vand.u32 4294901760, %v8856_v10  ;;  %v3782_v46 = vand.u32 4294901760, %v8865_v11 }
 0x316   : > { %7204 = vmatprep.subr.bf16.mxu0 %v7203_v26  ;;  %v7227_v29 = vpack.c.bf16 %v3766_v31, %v3754_v44  ;;  %3727 = vmatprep.mubr.f32.mxu1 %v7967_v6  ;;  %v3772_v63 = vand.u32 4294901760, %v3771_v1  ;;  %v3162_v51 = vsub.f32 %v8881_v60, %v3161_v40  ;;  %v7207_v62 = vpack.c.bf16 %v8832_v55, %v8810_v27  ;;  %v7063_v31 = vld [vmem:[%s9724_s2 + $0x160] sm:$0xf] }
 0x317   : > { %v7205_v3 = vpack.c.bf16 %v3157_v28, %v3145_v24  ;;  %v3777_v39 = vsub.f32 %v8886_v30, %v3776_v18  ;;  %v3168_v33 = vsub.f32 %v8856_v10, %v3167_v45  ;;  %v3783_v44 = vsub.f32 %v8865_v11, %v3782_v46  ;;  %v7065_v28 = vld [vmem:[%s9724_s2 + $0x170] sm:$0xf] }
 0x318   : > { %7228 = vmatprep.subr.bf16.mxu1 %v7227_v29  ;;  %v7229_v49 = vpack.c.bf16 %v3772_v63, %v3760_v34  ;;  %3118 = vmatmul.mubr.f32.gmra.mrb[14].mxu0 %v8812_v37  ;;  %v3163_v17 = vand.u32 4294901760, %v3162_v51  ;;  %v7231_v55 = vpack.c.bf16 %v8840_v42, %v8816_v54  ;;  %v7209_v61 = vpack.c.bf16 %v8822_v21, %v8804_v16 }
 0x319   : > { %7206 = vmatpush1.bf16.msra.mxu0 %v7205_v3  ;;  %3733 = vmatmul.mubr.f32.gmra.mrb[14].mxu1 %v8812_v37  ;;  %v3778_v24 = vand.u32 4294901760, %v3777_v39  ;;  %v7233_v2 = vpack.c.bf16 %v8827_v53, %v8806_v32  ;;  %v7215_v34 = vpack.c.bf16 %v3149_v50, %v3137_v22  ;;  %v7239_v26 = vpack.c.bf16 %v3764_v47, %v3752_v59  ;;  %v7058_v32 = vld [vmem:[%s9724_s2 + $0x138] sm:$0xff]  ;;  %v7059_v59 = vld [vmem:[%s9724_s2 + $0x140] sm:$0xff] }
 0x31a   : > { %7230 = vmatpush1.bf16.msra.mxu1 %v7229_v49  ;;  %3164 = vmatprep.subr.mxu0 %v3163_v17  ;;  %v7217_v42 = vpack.c.bf16 %v3155_v0, %v3143_v9  ;;  %v3169_v21 = vand.u32 4294901760, %v3168_v33  ;;  %v7241_v37 = vpack.c.bf16 %v3770_v43, %v3758_v20  ;;  %v3784_v53 = vand.u32 4294901760, %v3783_v44 }
 0x31b   : > { %3779 = vmatprep.subr.mxu1 %v3778_v24  ;;  %3123 = vmatprep.mubr.f32.mxu0 %v7967_v6 }
 0x31c   : > { %3738 = vmatprep.mubr.f32.mxu1 %v7967_v6  ;;  %3129 = vmatmul.mubr.f32.gmra.mrb[16].mxu0 %v8814_v35 }
 0x31d   : > { %3170 = vmatpush1.msra.mxu0 %v3169_v21  ;;  %3744 = vmatmul.mubr.f32.gmra.mrb[16].mxu1 %v8814_v35 }
 0x31e   : > { %3785 = vmatpush1.msra.mxu1 %v3784_v53  ;;  %7208 = vmatprep.subr.bf16.mxu0 %v7207_v62 }
 0x31f   : > { %7232 = vmatprep.subr.bf16.mxu1 %v7231_v55  ;;  %3229 = vmatprep.mubr.f32.mxu0 %v7967_v6 }
 0x320   : > { %3844 = vmatprep.mubr.f32.mxu1 %v7967_v6  ;;  %3231 = vmatmul.mubr.f32.vlgmr.msra.gmra.mrb[12].mxu0 %v8750_v13 }
 0x321   : > { %7210 = vmatpush1.bf16.msra.mxu0 %v7209_v61  ;;  %3846 = vmatmul.mubr.f32.vlgmr.msra.gmra.mrb[12].mxu1 %v8750_v13 }
 0x322   : > { %7234 = vmatpush1.bf16.msra.mxu1 %v7233_v2  ;;  %3265 = vmatprep.subr.mxu0 %v8881_v60 }
 0x323   : > { %3880 = vmatprep.subr.mxu1 %v8886_v30  ;;  %3236 = vmatprep.mubr.f32.mxu0 %v7967_v6 }
 0x324   : > { %3851 = vmatprep.mubr.f32.mxu1 %v7967_v6  ;;  %3238 = vmatmul.mubr.f32.gmra.mrb[14].mxu0 %v8752_v19 }
 0x325   : > { %3268 = vmatpush1.msra.mxu0 %v8856_v10  ;;  %3853 = vmatmul.mubr.f32.gmra.mrb[14].mxu1 %v8752_v19 }
 0x326   : > { %3883 = vmatpush1.msra.mxu1 %v8865_v11  ;;  %7212 = vmatprep.subr.bf16.mxu0 %v8830_v48 }
 0x327   : > { %7236 = vmatprep.subr.bf16.mxu1 %v8838_v38  ;;  %3243 = vmatprep.mubr.f32.mxu0 %v7967_v6 }
 0x328   : > { %3858 = vmatprep.mubr.f32.mxu1 %v7967_v6  ;;  %3245 = vmatmul.mubr.f32.gmra.mrb[16].mxu0 %v8757_v12 }
 0x329   : > { %3860 = vmatmul.mubr.f32.gmra.mrb[16].mxu1 %v8757_v12  ;;  %3327 = vmatprep.mubr.f32.mxu0 %v7967_v6 }
 0x32a   : > { %3942 = vmatprep.mubr.f32.mxu1 %v7967_v6 }
 0x32c   : > { %3330 = vmatmul.mubr.f32.vlgmr.msra.gmra.mrb[12].mxu0 %v8769_v14 }
 0x32d   : > { %7214 = vmatpush1.bf16.msra.mxu0 %v8820_v52  ;;  %3945 = vmatmul.mubr.f32.vlgmr.msra.gmra.mrb[12].mxu1 %v8769_v14  ;;  %v7069_v14 = vld [vmem:[%s9723_s1 + $0x70] sm:$0xf] }
 0x32e   : > { %7238 = vmatpush1.bf16.msra.mxu1 %v8825_v36  ;;  %3361 = vmatprep.subr.mxu0 %v8852_v15 }
 0x32f   : > { %3976 = vmatprep.subr.mxu1 %v8862_v5  ;;  %3335 = vmatprep.mubr.f32.mxu0 %v7967_v6 }
 0x330   : > { %3950 = vmatprep.mubr.f32.mxu1 %v7967_v6  ;;  %3338 = vmatmul.mubr.f32.gmra.mrb[14].mxu0 %v8772_v4 }
 0x331   : > { %3363 = vmatpush1.msra.mxu0 %v8842_v23  ;;  %3953 = vmatmul.mubr.f32.gmra.mrb[14].mxu1 %v8772_v4 }
 0x332   : > { %3978 = vmatpush1.msra.mxu1 %v8847_v41  ;;  %7216 = vmatprep.subr.bf16.mxu0 %v7215_v34 }
 0x333   : > { %7240 = vmatprep.subr.bf16.mxu1 %v7239_v26  ;;  %3343 = vmatprep.mubr.f32.mxu0 %v7967_v6 }
 0x334   : > { %3958 = vmatprep.mubr.f32.mxu1 %v7967_v6  ;;  %3346 = vmatmul.mubr.f32.gmra.mrb[16].mxu0 %v8778_v56 }
 0x335   : > { %3961 = vmatmul.mubr.f32.gmra.mrb[16].mxu1 %v8778_v56  ;;  %3422 = vmatprep.mubr.f32.mxu0 %v7967_v6 }
 0x336   : > { %4037 = vmatprep.mubr.f32.mxu1 %v7967_v6 }
 0x338   : > { %3426 = vmatmul.mubr.f32.vlgmr.msra.gmra.mrb[12].mxu0 %v8790_v25 }
 0x339   : > { %7218 = vmatpush1.bf16.msra.mxu0 %v7217_v42  ;;  %4041 = vmatmul.mubr.f32.vlgmr.msra.gmra.mrb[12].mxu1 %v8790_v25  ;;  %v7057_v25 = vld [vmem:[%s9724_s2 + $0x130] sm:$0xff] }
 0x33a   : > { %7242 = vmatpush1.bf16.msra.mxu1 %v7241_v37  ;;  %3469 = vmatprep.subr.mxu0 %v3161_v40 }
 0x33b   : > { %4084 = vmatprep.subr.mxu1 %v3776_v18  ;;  %3431 = vmatprep.mubr.f32.mxu0 %v7967_v6  ;;  %v7064_v18 = vld [vmem:[%s9724_s2 + $0x168] sm:$0xf] }
 0x33c   : > { %4046 = vmatprep.mubr.f32.mxu1 %v7967_v6  ;;  %3435 = vmatmul.mubr.f32.gmra.mrb[14].mxu0 %v8793_v57 }
 0x33d   : > { %3473 = vmatpush1.msra.mxu0 %v3167_v45  ;;  %4050 = vmatmul.mubr.f32.gmra.mrb[14].mxu1 %v8793_v57  ;;  %v7056_v57 = vld [vmem:[%s9724_s2 + $0x128] sm:$0xff] }
 0x33e   : > { %4088 = vmatpush1.msra.mxu1 %v3782_v46  ;;  %7220 = vmatprep.subr.bf16.mxu0 %v8830_v48  ;;  %v7066_v46 = vld [vmem:[%s9724_s2 + $0x178] sm:$0xf] }
 0x33f   : > { %7244 = vmatprep.subr.bf16.mxu1 %v8838_v38  ;;  %3440 = vmatprep.mubr.f32.mxu0 %v7967_v6 }
 0x340   : > { %4055 = vmatprep.mubr.f32.mxu1 %v7967_v6  ;;  %3444 = vmatmul.mubr.f32.gmra.mrb[16].mxu0 %v8796_v58 }
 0x341   : > { %4059 = vmatmul.mubr.f32.gmra.mrb[16].mxu1 %v8796_v58  ;;  %3532 = vmatprep.mubr.f32.mxu0 %v7967_v6  ;;  %v4297_v58 = vsel %vm448_vm0, %v7069_v14, 0 }
 0x342   : > { %4147 = vmatprep.mubr.f32.mxu1 %v7967_v6  ;;  %v9053_v48 = vand.u32 4294901760, %v4297_v58 }
 0x344   : > { %3534 = vmatmul.mubr.f32.vlgmr.msra.gmra.mrb[12].mxu0 %v8750_v13  ;;  %v9074_v1 = vsub.f32 %v4297_v58, %v9053_v48 }
 0x345   : > { %7222 = vmatpush1.bf16.msra.mxu0 %v8820_v52  ;;  %4149 = vmatmul.mubr.f32.vlgmr.msra.gmra.mrb[12].mxu1 %v8750_v13 }
 0x346   : > { %7246 = vmatpush1.bf16.msra.mxu1 %v8825_v36  ;;  %3563 = vmatprep.subr.mxu0 %v8852_v15  ;;  %v7062_v15 = vld [vmem:[%s9724_s2 + $0x158] sm:$0xff]  ;;  %v9092_v49 = vand.u32 4294901760, %v9074_v1 }
 0x347   : > { %4178 = vmatprep.subr.mxu1 %v8862_v5  ;;  %3539 = vmatprep.mubr.f32.mxu0 %v7967_v6 }
 0x348   : > { %4154 = vmatprep.mubr.f32.mxu1 %v7967_v6  ;;  %3541 = vmatmul.mubr.f32.gmra.mrb[14].mxu0 %v8752_v19  ;;  %v4407_v26 = vsub.f32 %v9074_v1, %v9092_v49 }
 0x349   : > { %3565 = vmatpush1.msra.mxu0 %v8842_v23  ;;  %4156 = vmatmul.mubr.f32.gmra.mrb[14].mxu1 %v8752_v19  ;;  %v7061_v23 = vld [vmem:[%s9724_s2 + $0x150] sm:$0xff] }
 0x34a   : > { %4180 = vmatpush1.msra.mxu1 %v8847_v41  ;;  %3546 = vmatprep.mubr.f32.mxu0 %v7967_v6  ;;  %v7060_v41 = vld [vmem:[%s9724_s2 + $0x148] sm:$0xff] }
 0x34b   : > { %4161 = vmatprep.mubr.f32.mxu1 %v7967_v6 }
 0x34c   : > { %3548 = vmatmul.mubr.f32.gmra.mrb[16].mxu0 %v8757_v12 }
 0x34d   : > { %4163 = vmatmul.mubr.f32.gmra.mrb[16].mxu1 %v8757_v12  ;;  %3624 = vmatprep.mubr.f32.mxu0 %v7967_v6 }
 0x34e   : > { %4239 = vmatprep.mubr.f32.mxu1 %v7967_v6 }
 0x350   : > { %3626 = vmatmul.mubr.f32.vlgmr.msra.gmra.mrb[12].mxu0 %v8750_v13 }
 0x351   : > { %4241 = vmatmul.mubr.f32.vlgmr.msra.gmra.mrb[12].mxu1 %v8750_v13  ;;  %3631 = vmatprep.mubr.f32.mxu0 %v7967_v6  ;;  %v7067_v13 = vld [vmem:[%s9723_s1 + $0x60] sm:$0xff] }
 0x352   : > { %4246 = vmatprep.mubr.f32.mxu1 %v7967_v6  ;;  %v4291_v4 = vsel %vm448_vm0, %v7067_v13, 0 }
 0x353   : > { %v9046_v9 = vand.u32 4294901760, %v4291_v4 }
 0x354   : > { %3633 = vmatmul.mubr.f32.gmra.mrb[14].mxu0 %v8752_v19 }
 0x355   : > { %4248 = vmatmul.mubr.f32.gmra.mrb[14].mxu1 %v8752_v19  ;;  %3638 = vmatprep.mubr.f32.mxu0 %v7967_v6  ;;  %v7068_v19 = vld [vmem:[%s9723_s1 + $0x68] sm:$0xff]  ;;  %v9065_v47 = vsub.f32 %v4291_v4, %v9046_v9 }
 0x356   : > { %4253 = vmatprep.mubr.f32.mxu1 %v7967_v6  ;;  %v4294_v56 = vsel %vm448_vm0, %v7068_v19, 0 }
 0x357   : > { %v9048_v20 = vand.u32 4294901760, %v4294_v56  ;;  %v9086_v62 = vand.u32 4294901760, %v9065_v47 }
 0x358   : > { %3640 = vmatmul.mubr.f32.gmra.mrb[16].mxu0 %v8757_v12 }
 0x359   : > { %4255 = vmatmul.mubr.f32.gmra.mrb[16].mxu1 %v8757_v12  ;;  %4381 = vmatprep.mubr.f32.mxu0 %v7967_v6  ;;  %v7055_v12 = vld [vmem:[%s9724_s2 + $0x120] sm:$0xff]  ;;  %v9068_v0 = vsub.f32 %v4294_v56, %v9048_v20  ;;  %v4385_v61 = vsub.f32 %v9065_v47, %v9086_v62 }
 0x35a   : > { %4996 = vmatprep.mubr.f32.mxu1 %v7967_v6 }
 0x35b   : > { %v9089_v3 = vand.u32 4294901760, %v9068_v0  ;;  %v9104_v4 = vand.u32 4294901760, %v4385_v61 }
 0x35d   : > { %v4396_v34 = vsub.f32 %v9068_v0, %v9089_v3 }
 0x35f   : > { %v9108_v58 = vand.u32 4294901760, %v4396_v34 }
 0x423   : > { %v3627_v16 = vpop.f32.mrb[12].mxu0 }
 0x424   : > { %v7367_v27 = vadd.f32 %v7055_v12, %v3627_v16  ;;  %v4242_v35 = vpop.f32.mrb[12].mxu1  ;;  %v3629_v54 = vpop.f32.mrb[13].mxu0  ;;  %v9110_v16 = vand.u32 4294901760, %v4407_v26 }
 0x425   : > { %v7373_v52 = vadd.f32 %v7057_v25, %v4242_v35  ;;  %v7368_v22 = vadd.f32 %v7056_v57, %v3629_v54  ;;  %v4244_v36 = vpop.f32.mrb[13].mxu1 }
 0x426   : > { %7828 = vtanh.f32 %v7367_v27  ;;  %v7374_v38 = vadd.f32 %v7058_v32, %v4244_v36 }
 0x427   : > { %7830 = vtanh.f32 %v7373_v52  ;;  %v3634_v50 = vpop.f32.mrb[14].mxu0 }
 0x428   : > { %7832 = vtanh.f32 %v7368_v22  ;;  %v7369_v10 = vadd.f32 %v7059_v59, %v3634_v50  ;;  %v4249_v5 = vpop.f32.mrb[14].mxu1  ;;  %v3636_v11 = vpop.f32.mrb[15].mxu0 }
 0x429   : > { %7834 = vtanh.f32 %v7374_v38  ;;  %v7375_v43 = vadd.f32 %v7061_v23, %v4249_v5  ;;  %v7370_v60 = vadd.f32 %v7060_v41, %v3636_v11  ;;  %v4251_v30 = vpop.f32.mrb[15].mxu1 }
 0x42a   : > { %7836 = vtanh.f32 %v7369_v10  ;;  %v7376_v40 = vadd.f32 %v7062_v15, %v4251_v30 }
 0x42b   : > { %7838 = vtanh.f32 %v7375_v43  ;;  %v3641_v45 = vpop.f32.mrb[16].mxu0 }
 0x42c   : > { %7840 = vtanh.f32 %v7370_v60  ;;  %v7371_v29 = vadd.f32 %v7063_v31, %v3641_v45  ;;  %v4256_v63 = vpop.f32.mrb[16].mxu1  ;;  %v3643_v51 = vpop.f32.mrb[17].mxu0 }
 0x42d   : > { %7842 = vtanh.f32 %v7376_v40  ;;  %v7377_v39 = vadd.f32 %v7065_v28, %v4256_v63  ;;  %v7372_v33 = vadd.f32 %v7064_v18, %v3643_v51  ;;  %v4258_v44 = vpop.f32.mrb[17].mxu1 }
 0x42e   : > { %7844 = vtanh.f32 %v7371_v29  ;;  %v7378_v17 = vadd.f32 %v7066_v46, %v4258_v44 }
 0x42f   : > { %7846 = vtanh.f32 %v7377_v39 }
 0x430   : > { %v7829_v55 = vpop.eup %7828  ;;  %7848 = vtanh.f32 %v7372_v33 }
 0x431   : > { %v7831_v24 = vpop.eup %7830  ;;  %7850 = vtanh.f32 %v7378_v17  ;;  %v4313_v2 = vand.u32 4294901760, %v7829_v55 }
 0x432   : > { %v7833_v42 = vpop.eup %7832  ;;  %v4928_v21 = vand.u32 4294901760, %v7831_v24 }
 0x433   : > { %v7835_v37 = vpop.eup %7834  ;;  %v4311_v53 = vand.u32 4294901760, %v7833_v42  ;;  %v9100_v13 = vsub.f32 %v7829_v55, %v4313_v2 }
 0x434   : > { %v7837_v19 = vpop.eup %7836  ;;  %v4926_v14 = vand.u32 4294901760, %v7835_v37  ;;  %v9102_v12 = vsub.f32 %v7831_v24, %v4928_v21 }
 0x435   : > { %v7839_v56 = vpop.eup %7838  ;;  %v9106_v25 = vsub.f32 %v7833_v42, %v4311_v53  ;;  %v4317_v57 = vand.u32 4294901760, %v7837_v19  ;;  %v4423_v54 = vand.u32 4294901760, %v9100_v13 }
 0x436   : > { %v7841_v32 = vpop.eup %7840  ;;  %v9112_v27 = vsub.f32 %v7835_v37, %v4926_v14  ;;  %v4932_v35 = vand.u32 4294901760, %v7839_v56  ;;  %v5038_v52 = vand.u32 4294901760, %v9102_v12 }
 0x437   : > { %v7843_v22 = vpop.eup %7842  ;;  %v4315_v36 = vand.u32 4294901760, %v7841_v32  ;;  %v9116_v59 = vpack.c.bf16 %v4317_v57, %v4313_v2  ;;  %v9118_v38 = vsub.f32 %v7837_v19, %v4317_v57  ;;  %v4417_v23 = vand.u32 4294901760, %v9106_v25 }
 0x438   : > { %v7845_v41 = vpop.eup %7844  ;;  %v4930_v50 = vand.u32 4294901760, %v7843_v22  ;;  %v9121_v15 = vpack.c.bf16 %v4932_v35, %v4928_v21  ;;  %v9123_v10 = vsub.f32 %v7839_v56, %v4932_v35  ;;  %v5032_v5 = vand.u32 4294901760, %v9112_v27 }
 0x439   : > { %v7847_v11 = vpop.eup %7846  ;;  %v9126_v43 = vpack.c.bf16 %v4315_v36, %v4311_v53  ;;  %v9128_v60 = vsub.f32 %v7841_v32, %v4315_v36  ;;  %v4300_v30 = vsel %vm458_vm1, %v7845_v41, 0  ;;  %v4418_v31 = vsub.f32 %v9106_v25, %v4417_v23 }
 0x43a   : > { %v7849_v40 = vpop.eup %7848  ;;  %v9134_v28 = vpack.c.bf16 %v4930_v50, %v4926_v14  ;;  %v9136_v18 = vsub.f32 %v7843_v22, %v4930_v50  ;;  %v9138_v45 = vand.u32 4294901760, %v4300_v30  ;;  %v4306_v46 = vsel %vm458_vm1, %v7847_v11, 0 }
 0x43b   : > { %v7851_v29 = vpop.eup %7850  ;;  %7248 = vmatprep.subr.bf16.mxu0 %v9126_v43  ;;  %v4303_v63 = vsel %vm458_vm1, %v7849_v40, 0  ;;  %v9143_v51 = vand.u32 4294901760, %v4306_v46  ;;  %v4419_v39 = vand.u32 4294901760, %v4418_v31  ;;  %v4429_v33 = vand.u32 4294901760, %v9128_v60 }
 0x43c   : > { %7272 = vmatprep.subr.bf16.mxu1 %v9134_v28  ;;  %7250 = vmatpush1.bf16.msra.mxu0 %v9116_v59  ;;  %v9148_v44 = vand.u32 4294901760, %v4303_v63  ;;  %v4309_v17 = vsel %vm458_vm1, %v7851_v29, 0  ;;  %v9152_v55 = vsub.f32 %v4300_v30, %v9138_v45  ;;  %v5033_v61 = vsub.f32 %v9112_v27, %v5032_v5 }
 0x43d   : > { %7274 = vmatpush1.bf16.msra.mxu1 %v9121_v15  ;;  %v9158_v24 = vand.u32 4294901760, %v4309_v17  ;;  %v9161_v2 = vsub.f32 %v4306_v46, %v9143_v51  ;;  %v4430_v34 = vsub.f32 %v9128_v60, %v4429_v33  ;;  %v5044_v26 = vand.u32 4294901760, %v9136_v18 }
 0x43e   : > { %4320 = vmatprep.subr.mxu0 %v9148_v44  ;;  %v5034_v42 = vand.u32 4294901760, %v5033_v61  ;;  %v4424_v21 = vsub.f32 %v9100_v13, %v4423_v54  ;;  %v4435_v37 = vand.u32 4294901760, %v9118_v38  ;;  %v5039_v53 = vsub.f32 %v9102_v12, %v5038_v52 }
 0x43f   : > { %4935 = vmatprep.subr.mxu1 %v9158_v24  ;;  %v4431_v19 = vand.u32 4294901760, %v4430_v34  ;;  %v5045_v14 = vsub.f32 %v9136_v18, %v5044_v26  ;;  %v5050_v56 = vand.u32 4294901760, %v9123_v10  ;;  %v9177_v57 = vsub.f32 %v4303_v63, %v9148_v44 }
 0x440   : > { %4322 = vmatpush1.msra.mxu0 %v9138_v45  ;;  %v4425_v32 = vand.u32 4294901760, %v4424_v21  ;;  %v4436_v35 = vsub.f32 %v9118_v38, %v4435_v37  ;;  %v5040_v22 = vand.u32 4294901760, %v5039_v53  ;;  %v9182_v36 = vsub.f32 %v4309_v17, %v9158_v24 }
 0x441   : > { %4937 = vmatpush1.msra.mxu1 %v9143_v51  ;;  %4387 = vmatmul.mubr.f32.vlgmr.msra.gmra.mrb[18].mxu0 %v9104_v4  ;;  %v7251_v41 = vpack.c.bf16 %v4431_v19, %v4419_v39  ;;  %v5046_v50 = vand.u32 4294901760, %v5045_v14  ;;  %v5051_v11 = vsub.f32 %v9123_v10, %v5050_v56  ;;  %v4441_v30 = vand.u32 4294901760, %v9177_v57 }
 0x442   : > { %5002 = vmatmul.mubr.f32.vlgmr.msra.gmra.mrb[18].mxu1 %v9104_v4  ;;  %4392 = vmatprep.mubr.f32.mxu0 %v7967_v6  ;;  %v4437_v31 = vand.u32 4294901760, %v4436_v35  ;;  %v5056_v40 = vand.u32 4294901760, %v9182_v36  ;;  %v4447_v46 = vand.u32 4294901760, %v9152_v55  ;;  %v5062_v29 = vand.u32 4294901760, %v9161_v2 }
 0x443   : > { %7252 = vmatprep.subr.bf16.mxu0 %v7251_v41  ;;  %v7275_v63 = vpack.c.bf16 %v5046_v50, %v5034_v42  ;;  %5007 = vmatprep.mubr.f32.mxu1 %v7967_v6  ;;  %v5052_v39 = vand.u32 4294901760, %v5051_v11  ;;  %v4442_v17 = vsub.f32 %v9177_v57, %v4441_v30  ;;  %v7255_v4 = vpack.c.bf16 %v9128_v60, %v9106_v25 }
 0x444   : > { %v7253_v61 = vpack.c.bf16 %v4437_v31, %v4425_v32  ;;  %v5057_v34 = vsub.f32 %v9182_v36, %v5056_v40  ;;  %v4448_v21 = vsub.f32 %v9152_v55, %v4447_v46  ;;  %v5063_v42 = vsub.f32 %v9161_v2, %v5062_v29  ;;  %v7078_v31 = vld [vmem:[%s9724_s2 + $0x1c0] sm:$0xf] }
 0x445   : > { %7276 = vmatprep.subr.bf16.mxu1 %v7275_v63  ;;  %v7277_v53 = vpack.c.bf16 %v5052_v39, %v5040_v22  ;;  %4398 = vmatmul.mubr.f32.gmra.mrb[20].mxu0 %v9108_v58  ;;  %v4443_v19 = vand.u32 4294901760, %v4442_v17  ;;  %v7279_v60 = vpack.c.bf16 %v9136_v18, %v9112_v27  ;;  %v7257_v14 = vpack.c.bf16 %v9118_v38, %v9100_v13  ;;  %v7072_v13 = vld [vmem:[%s9724_s2 + $0x190] sm:$0xff]  ;;  %v7073_v27 = vld [vmem:[%s9724_s2 + $0x198] sm:$0xff]  ;;  %v7079_v63 = vld [vmem:[%s9724_s2 + $0x1c8] sm:$0xf] }
 0x446   : > { %7254 = vmatpush1.bf16.msra.mxu0 %v7253_v61  ;;  %5013 = vmatmul.mubr.f32.gmra.mrb[20].mxu1 %v9108_v58  ;;  %v5058_v32 = vand.u32 4294901760, %v5057_v34  ;;  %v7281_v35 = vpack.c.bf16 %v9123_v10, %v9102_v12  ;;  %v7263_v22 = vpack.c.bf16 %v4429_v33, %v4417_v23  ;;  %v7287_v41 = vpack.c.bf16 %v5044_v26, %v5032_v5  ;;  %v7071_v12 = vld [vmem:[%s9724_s2 + $0x188] sm:$0xff]  ;;  %v7081_v17 = vld [vmem:[%s9724_s2 + $0x1d8] sm:$0xf] }
 0x447   : > { %7278 = vmatpush1.bf16.msra.mxu1 %v7277_v53  ;;  %4444 = vmatprep.subr.mxu0 %v4443_v19  ;;  %v7265_v18 = vpack.c.bf16 %v4435_v37, %v4423_v54  ;;  %v4449_v38 = vand.u32 4294901760, %v4448_v21  ;;  %v7289_v58 = vpack.c.bf16 %v5050_v56, %v5038_v52  ;;  %v5064_v10 = vand.u32 4294901760, %v5063_v42 }
 0x448   : > { %5059 = vmatprep.subr.mxu1 %v5058_v32  ;;  %4403 = vmatprep.mubr.f32.mxu0 %v7967_v6 }
 0x449   : > { %5018 = vmatprep.mubr.f32.mxu1 %v7967_v6  ;;  %4409 = vmatmul.mubr.f32.gmra.mrb[22].mxu0 %v9110_v16 }
 0x44a   : > { %4450 = vmatpush1.msra.mxu0 %v4449_v38  ;;  %5024 = vmatmul.mubr.f32.gmra.mrb[22].mxu1 %v9110_v16 }
 0x44b   : > { %5065 = vmatpush1.msra.mxu1 %v5064_v10  ;;  %7256 = vmatprep.subr.bf16.mxu0 %v7255_v4 }
 0x44c   : > { %7280 = vmatprep.subr.bf16.mxu1 %v7279_v60  ;;  %4509 = vmatprep.mubr.f32.mxu0 %v7967_v6 }
 0x44d   : > { %5124 = vmatprep.mubr.f32.mxu1 %v7967_v6  ;;  %4511 = vmatmul.mubr.f32.vlgmr.msra.gmra.mrb[18].mxu0 %v9046_v9 }
 0x44e   : > { %7258 = vmatpush1.bf16.msra.mxu0 %v7257_v14  ;;  %5126 = vmatmul.mubr.f32.vlgmr.msra.gmra.mrb[18].mxu1 %v9046_v9 }
 0x44f   : > { %7282 = vmatpush1.bf16.msra.mxu1 %v7281_v35  ;;  %4545 = vmatprep.subr.mxu0 %v9177_v57 }
 0x450   : > { %5160 = vmatprep.subr.mxu1 %v9182_v36  ;;  %4516 = vmatprep.mubr.f32.mxu0 %v7967_v6 }
 0x451   : > { %5131 = vmatprep.mubr.f32.mxu1 %v7967_v6  ;;  %4518 = vmatmul.mubr.f32.gmra.mrb[20].mxu0 %v9048_v20 }
 0x452   : > { %4548 = vmatpush1.msra.mxu0 %v9152_v55  ;;  %5133 = vmatmul.mubr.f32.gmra.mrb[20].mxu1 %v9048_v20  ;;  %v7075_v55 = vld [vmem:[%s9724_s2 + $0x1a8] sm:$0xff] }
 0x453   : > { %5163 = vmatpush1.msra.mxu1 %v9161_v2  ;;  %7260 = vmatprep.subr.bf16.mxu0 %v9126_v43  ;;  %v7077_v2 = vld [vmem:[%s9724_s2 + $0x1b8] sm:$0xff] }
 0x454   : > { %7284 = vmatprep.subr.bf16.mxu1 %v9134_v28  ;;  %4523 = vmatprep.mubr.f32.mxu0 %v7967_v6 }
 0x455   : > { %5138 = vmatprep.mubr.f32.mxu1 %v7967_v6  ;;  %4525 = vmatmul.mubr.f32.gmra.mrb[22].mxu0 %v9053_v48 }
 0x456   : > { %5140 = vmatmul.mubr.f32.gmra.mrb[22].mxu1 %v9053_v48  ;;  %4607 = vmatprep.mubr.f32.mxu0 %v7967_v6 }
 0x457   : > { %5222 = vmatprep.mubr.f32.mxu1 %v7967_v6 }
 0x459   : > { %4610 = vmatmul.mubr.f32.vlgmr.msra.gmra.mrb[18].mxu0 %v9065_v47 }
 0x45a   : > { %7262 = vmatpush1.bf16.msra.mxu0 %v9116_v59  ;;  %5225 = vmatmul.mubr.f32.vlgmr.msra.gmra.mrb[18].mxu1 %v9065_v47  ;;  %v7017_v47 = vld [vmem:[%s9723_s1 + $0xa0] sm:$0xf] }
 0x45b   : > { %7286 = vmatpush1.bf16.msra.mxu1 %v9121_v15  ;;  %4641 = vmatprep.subr.mxu0 %v9148_v44 }
 0x45c   : > { %5256 = vmatprep.subr.mxu1 %v9158_v24  ;;  %4615 = vmatprep.mubr.f32.mxu0 %v7967_v6 }
 0x45d   : > { %5230 = vmatprep.mubr.f32.mxu1 %v7967_v6  ;;  %4618 = vmatmul.mubr.f32.gmra.mrb[20].mxu0 %v9068_v0 }
 0x45e   : > { %4643 = vmatpush1.msra.mxu0 %v9138_v45  ;;  %5233 = vmatmul.mubr.f32.gmra.mrb[20].mxu1 %v9068_v0  ;;  %v7083_v0 = vld [vmem:[%s9723_s1 + $0x80] sm:$0xff] }
 0x45f   : > { %5258 = vmatpush1.msra.mxu1 %v9143_v51  ;;  %7264 = vmatprep.subr.bf16.mxu0 %v7263_v22 }
 0x460   : > { %7288 = vmatprep.subr.bf16.mxu1 %v7287_v41  ;;  %4623 = vmatprep.mubr.f32.mxu0 %v7967_v6 }
 0x461   : > { %5238 = vmatprep.mubr.f32.mxu1 %v7967_v6  ;;  %4626 = vmatmul.mubr.f32.gmra.mrb[22].mxu0 %v9074_v1 }
 0x462   : > { %5241 = vmatmul.mubr.f32.gmra.mrb[22].mxu1 %v9074_v1  ;;  %4702 = vmatprep.mubr.f32.mxu0 %v7967_v6  ;;  %v7084_v1 = vld [vmem:[%s9723_s1 + $0x88] sm:$0xf] }
 0x463   : > { %5317 = vmatprep.mubr.f32.mxu1 %v7967_v6  ;;  %v5577_v25 = vsel %vm448_vm0, %v7084_v1, 0 }
 0x465   : > { %4706 = vmatmul.mubr.f32.vlgmr.msra.gmra.mrb[18].mxu0 %v9086_v62 }
 0x466   : > { %7266 = vmatpush1.bf16.msra.mxu0 %v7265_v18  ;;  %5321 = vmatmul.mubr.f32.vlgmr.msra.gmra.mrb[18].mxu1 %v9086_v62  ;;  %v7070_v62 = vld [vmem:[%s9724_s2 + $0x180] sm:$0xff] }
 0x467   : > { %7290 = vmatpush1.bf16.msra.mxu1 %v7289_v58  ;;  %4749 = vmatprep.subr.mxu0 %v4441_v30 }
 0x468   : > { %5364 = vmatprep.subr.mxu1 %v5056_v40  ;;  %4711 = vmatprep.mubr.f32.mxu0 %v7967_v6 }
 0x469   : > { %5326 = vmatprep.mubr.f32.mxu1 %v7967_v6  ;;  %4715 = vmatmul.mubr.f32.gmra.mrb[20].mxu0 %v9089_v3 }
 0x46a   : > { %4753 = vmatpush1.msra.mxu0 %v4447_v46  ;;  %5330 = vmatmul.mubr.f32.gmra.mrb[20].mxu1 %v9089_v3 }
 0x46b   : > { %5368 = vmatpush1.msra.mxu1 %v5062_v29  ;;  %7268 = vmatprep.subr.bf16.mxu0 %v9126_v43  ;;  %v7080_v29 = vld [vmem:[%s9724_s2 + $0x1d0] sm:$0xf] }
 0x46c   : > { %7292 = vmatprep.subr.bf16.mxu1 %v9134_v28  ;;  %4720 = vmatprep.mubr.f32.mxu0 %v7967_v6 }
 0x46d   : > { %5335 = vmatprep.mubr.f32.mxu1 %v7967_v6  ;;  %4724 = vmatmul.mubr.f32.gmra.mrb[22].mxu0 %v9092_v49 }
 0x46e   : > { %5339 = vmatmul.mubr.f32.gmra.mrb[22].mxu1 %v9092_v49  ;;  %4812 = vmatprep.mubr.f32.mxu0 %v7967_v6  ;;  %v5574_v49 = vsel %vm448_vm0, %v7083_v0, 0 }
 0x46f   : > { %5427 = vmatprep.mubr.f32.mxu1 %v7967_v6 }
 0x471   : > { %4814 = vmatmul.mubr.f32.vlgmr.msra.gmra.mrb[18].mxu0 %v9046_v9 }
 0x472   : > { %7270 = vmatpush1.bf16.msra.mxu0 %v9116_v59  ;;  %5429 = vmatmul.mubr.f32.vlgmr.msra.gmra.mrb[18].mxu1 %v9046_v9 }
 0x473   : > { %7294 = vmatpush1.bf16.msra.mxu1 %v9121_v15  ;;  %4843 = vmatprep.subr.mxu0 %v9148_v44  ;;  %v9353_v15 = vand.u32 4294901760, %v5574_v49  ;;  %v7076_v44 = vld [vmem:[%s9724_s2 + $0x1b0] sm:$0xff] }
 0x474   : > { %5458 = vmatprep.subr.mxu1 %v9158_v24  ;;  %4819 = vmatprep.mubr.f32.mxu0 %v7967_v6 }
 0x475   : > { %5434 = vmatprep.mubr.f32.mxu1 %v7967_v6  ;;  %4821 = vmatmul.mubr.f32.gmra.mrb[20].mxu0 %v9048_v20  ;;  %v9373_v36 = vsub.f32 %v5574_v49, %v9353_v15 }
 0x476   : > { %4845 = vmatpush1.msra.mxu0 %v9138_v45  ;;  %5436 = vmatmul.mubr.f32.gmra.mrb[20].mxu1 %v9048_v20  ;;  %v7074_v45 = vld [vmem:[%s9724_s2 + $0x1a0] sm:$0xff] }
 0x477   : > { %5460 = vmatpush1.msra.mxu1 %v9143_v51  ;;  %4826 = vmatprep.mubr.f32.mxu0 %v7967_v6  ;;  %v9358_v51 = vand.u32 4294901760, %v5577_v25  ;;  %v9394_v42 = vand.u32 4294901760, %v9373_v36 }
 0x478   : > { %5441 = vmatprep.mubr.f32.mxu1 %v7967_v6 }
 0x479   : > { %4828 = vmatmul.mubr.f32.gmra.mrb[22].mxu0 %v9053_v48  ;;  %v9379_v40 = vsub.f32 %v5577_v25, %v9358_v51  ;;  %v5676_v38 = vsub.f32 %v9373_v36, %v9394_v42 }
 0x47a   : > { %5443 = vmatmul.mubr.f32.gmra.mrb[22].mxu1 %v9053_v48  ;;  %4904 = vmatprep.mubr.f32.mxu0 %v7967_v6 }
 0x47b   : > { %5519 = vmatprep.mubr.f32.mxu1 %v7967_v6  ;;  %v9397_v14 = vand.u32 4294901760, %v9379_v40  ;;  %v9413_v25 = vand.u32 4294901760, %v5676_v38 }
 0x47d   : > { %4906 = vmatmul.mubr.f32.vlgmr.msra.gmra.mrb[18].mxu0 %v9046_v9  ;;  %v5687_v58 = vsub.f32 %v9379_v40, %v9397_v14 }
 0x47e   : > { %5521 = vmatmul.mubr.f32.vlgmr.msra.gmra.mrb[18].mxu1 %v9046_v9  ;;  %4911 = vmatprep.mubr.f32.mxu0 %v7967_v6  ;;  %v7015_v9 = vld [vmem:[%s9723_s1 + $0x90] sm:$0xff] }
 0x47f   : > { %5526 = vmatprep.mubr.f32.mxu1 %v7967_v6  ;;  %6835 = vperm.xlu1 %7754, %v7015_v9  }
 0x481   : > { %4913 = vmatmul.mubr.f32.gmra.mrb[20].mxu0 %v9048_v20 }
 0x482   : > { %5528 = vmatmul.mubr.f32.gmra.mrb[20].mxu1 %v9048_v20  ;;  %4918 = vmatprep.mubr.f32.mxu0 %v7967_v6  ;;  %v7016_v20 = vld [vmem:[%s9723_s1 + $0x98] sm:$0xff] }
 0x483   : > { %5533 = vmatprep.mubr.f32.mxu1 %v7967_v6  ;;  %6840 = vperm.xlu0 %7755, %v7016_v20  }
 0x484   : > { %6845 = vperm.xlu1 %7754, %v7017_v47  }
 0x485   : > { %4920 = vmatmul.mubr.f32.gmra.mrb[22].mxu0 %v9053_v48 }
 0x486   : > { %5535 = vmatmul.mubr.f32.gmra.mrb[22].mxu1 %v9053_v48  ;;  %5661 = vmatprep.mubr.f32.mxu0 %v7967_v6  ;;  %v7082_v48 = vld [vmem:[%s9723_s1 + $0x78] sm:$0xff] }
 0x487   : > { %6276 = vmatprep.mubr.f32.mxu1 %v7967_v6  ;;  %v5571_v3 = vsel %vm448_vm0, %v7082_v48, 0 }
 0x488   : > { %v9351_v23 = vand.u32 4294901760, %v5571_v3 }
 0x48a   : > { %v9370_v57 = vsub.f32 %v5571_v3, %v9351_v23 }
 0x48c   : > { %v9391_v21 = vand.u32 4294901760, %v9370_v57 }
 0x48e   : > { %v5665_v22 = vsub.f32 %v9370_v57, %v9391_v21 }
 0x490   : > { %v9409_v3 = vand.u32 4294901760, %v5665_v22 }
 0x550   : > { %v4907_v16 = vpop.f32.mrb[18].mxu0 }
 0x551   : > { %v7379_v54 = vadd.f32 %v7070_v62, %v4907_v16  ;;  %v5522_v52 = vpop.f32.mrb[18].mxu1  ;;  %v4909_v59 = vpop.f32.mrb[19].mxu0  ;;  %v9415_v16 = vand.u32 4294901760, %v5687_v58 }
 0x552   : > { %v7385_v5 = vadd.f32 %v7072_v13, %v5522_v52  ;;  %v7380_v43 = vadd.f32 %v7071_v12, %v4909_v59  ;;  %v5524_v28 = vpop.f32.mrb[19].mxu1 }
 0x553   : > { %7852 = vtanh.f32 %v7379_v54  ;;  %v7386_v33 = vadd.f32 %v7073_v27, %v5524_v28 }
 0x554   : > { %7854 = vtanh.f32 %v7385_v5  ;;  %v4914_v24 = vpop.f32.mrb[20].mxu0 }
 0x555   : > { %7856 = vtanh.f32 %v7380_v43  ;;  %v7381_v26 = vadd.f32 %v7074_v45, %v4914_v24  ;;  %v5529_v37 = vpop.f32.mrb[20].mxu1  ;;  %v4916_v56 = vpop.f32.mrb[21].mxu0 }
 0x556   : > { %7858 = vtanh.f32 %v7386_v33  ;;  %v7387_v50 = vadd.f32 %v7076_v44, %v5529_v37  ;;  %v7382_v11 = vadd.f32 %v7075_v55, %v4916_v56  ;;  %v5531_v30 = vpop.f32.mrb[21].mxu1 }
 0x557   : > { %7860 = vtanh.f32 %v7381_v26  ;;  %v7388_v46 = vadd.f32 %v7077_v2, %v5531_v30 }
 0x558   : > { %7862 = vtanh.f32 %v7387_v50  ;;  %v4921_v39 = vpop.f32.mrb[22].mxu0 }
 0x559   : > { %7864 = vtanh.f32 %v7382_v11  ;;  %v7383_v4 = vadd.f32 %v7078_v31, %v4921_v39  ;;  %v5536_v61 = vpop.f32.mrb[22].mxu1  ;;  %v4923_v34 = vpop.f32.mrb[23].mxu0 }
 0x55a   : > { %7866 = vtanh.f32 %v7388_v46  ;;  %v7389_v53 = vadd.f32 %v7080_v29, %v5536_v61  ;;  %v7384_v19 = vadd.f32 %v7079_v63, %v4923_v34  ;;  %v5538_v60 = vpop.f32.mrb[23].mxu1 }
 0x55b   : > { %7868 = vtanh.f32 %v7383_v4  ;;  %v7390_v32 = vadd.f32 %v7081_v17, %v5538_v60 }
 0x55c   : > { %7870 = vtanh.f32 %v7389_v53 }
 0x55d   : > { %v7853_v35 = vpop.eup %7852  ;;  %7872 = vtanh.f32 %v7384_v19 }
 0x55e   : > { %v7855_v41 = vpop.eup %7854  ;;  %7874 = vtanh.f32 %v7390_v32  ;;  %v5593_v18 = vand.u32 4294901760, %v7853_v35 }
 0x55f   : > { %v7857_v10 = vpop.eup %7856  ;;  %v6208_v9 = vand.u32 4294901760, %v7855_v41 }
 0x560   : > { %v7859_v20 = vpop.eup %7858  ;;  %v5591_v47 = vand.u32 4294901760, %v7857_v10  ;;  %v9405_v48 = vsub.f32 %v7853_v35, %v5593_v18 }
 0x561   : > { %v7861_v0 = vpop.eup %7860  ;;  %v6206_v1 = vand.u32 4294901760, %v7859_v20  ;;  %v9407_v62 = vsub.f32 %v7855_v41, %v6208_v9 }
 0x562   : > { %v7863_v49 = vpop.eup %7862  ;;  %v9411_v13 = vsub.f32 %v7857_v10, %v5591_v47  ;;  %v5597_v12 = vand.u32 4294901760, %v7861_v0  ;;  %v5703_v59 = vand.u32 4294901760, %v9405_v48 }
 0x563   : > { %v7865_v27 = vpop.eup %7864  ;;  %v9417_v54 = vsub.f32 %v7859_v20, %v6206_v1  ;;  %v6212_v52 = vand.u32 4294901760, %v7863_v49  ;;  %v6318_v5 = vand.u32 4294901760, %v9407_v62 }
 0x564   : > { %v7867_v43 = vpop.eup %7866  ;;  %v5595_v28 = vand.u32 4294901760, %v7865_v27  ;;  %v9421_v45 = vpack.c.bf16 %v5597_v12, %v5593_v18  ;;  %v9423_v33 = vsub.f32 %v7861_v0, %v5597_v12  ;;  %v5697_v44 = vand.u32 4294901760, %v9411_v13 }
 0x565   : > { %v7869_v55 = vpop.eup %7868  ;;  %v6210_v24 = vand.u32 4294901760, %v7867_v43  ;;  %v9426_v2 = vpack.c.bf16 %v6212_v52, %v6208_v9  ;;  %v9428_v26 = vsub.f32 %v7863_v49, %v6212_v52  ;;  %v6312_v37 = vand.u32 4294901760, %v9417_v54 }
 0x566   : > { %v7871_v56 = vpop.eup %7870  ;;  %v9431_v50 = vpack.c.bf16 %v5595_v28, %v5591_v47  ;;  %v9433_v11 = vsub.f32 %v7865_v27, %v5595_v28  ;;  %v5580_v30 = vsel %vm458_vm1, %v7869_v55, 0  ;;  %v5698_v31 = vsub.f32 %v9411_v13, %v5697_v44 }
 0x567   : > { %v7873_v46 = vpop.eup %7872  ;;  %v9439_v29 = vpack.c.bf16 %v6210_v24, %v6206_v1  ;;  %v9441_v63 = vsub.f32 %v7867_v43, %v6210_v24  ;;  %v9443_v39 = vand.u32 4294901760, %v5580_v30  ;;  %v5586_v17 = vsel %vm458_vm1, %v7871_v56, 0 }
 0x568   : > { %v7875_v4 = vpop.eup %7874  ;;  %7296 = vmatprep.subr.bf16.mxu0 %v9431_v50  ;;  %v5583_v61 = vsel %vm458_vm1, %v7873_v46, 0  ;;  %v9448_v34 = vand.u32 4294901760, %v5586_v17  ;;  %v5699_v53 = vand.u32 4294901760, %v5698_v31  ;;  %v5709_v19 = vand.u32 4294901760, %v9433_v11 }
 0x569   : > { %7320 = vmatprep.subr.bf16.mxu1 %v9439_v29  ;;  %7298 = vmatpush1.bf16.msra.mxu0 %v9421_v45  ;;  %v9453_v60 = vand.u32 4294901760, %v5583_v61  ;;  %v5589_v32 = vsel %vm458_vm1, %v7875_v4, 0  ;;  %v9457_v35 = vsub.f32 %v5580_v30, %v9443_v39  ;;  %v6313_v22 = vsub.f32 %v9417_v54, %v6312_v37 }
 0x56a   : > { %7322 = vmatpush1.bf16.msra.mxu1 %v9426_v2  ;;  %v9463_v41 = vand.u32 4294901760, %v5589_v32  ;;  %v9466_v18 = vsub.f32 %v5586_v17, %v9448_v34  ;;  %v5710_v38 = vsub.f32 %v9433_v11, %v5709_v19  ;;  %v6324_v58 = vand.u32 4294901760, %v9441_v63 }
 0x56b   : > { %5600 = vmatprep.subr.mxu0 %v9453_v60  ;;  %v6314_v10 = vand.u32 4294901760, %v6313_v22  ;;  %v5704_v9 = vsub.f32 %v9405_v48, %v5703_v59  ;;  %v5715_v20 = vand.u32 4294901760, %v9423_v33  ;;  %v6319_v47 = vsub.f32 %v9407_v62, %v6318_v5 }
 0x56c   : > { %6215 = vmatprep.subr.mxu1 %v9463_v41  ;;  %v5711_v0 = vand.u32 4294901760, %v5710_v38  ;;  %v6325_v1 = vsub.f32 %v9441_v63, %v6324_v58  ;;  %v6330_v49 = vand.u32 4294901760, %v9428_v26  ;;  %v9482_v12 = vsub.f32 %v5583_v61, %v9453_v60 }
 0x56d   : > { %5602 = vmatpush1.msra.mxu0 %v9443_v39  ;;  %v5705_v27 = vand.u32 4294901760, %v5704_v9  ;;  %v5716_v52 = vsub.f32 %v9423_v33, %v5715_v20  ;;  %v6320_v43 = vand.u32 4294901760, %v6319_v47  ;;  %v9487_v28 = vsub.f32 %v5589_v32, %v9463_v41 }
 0x56e   : > { %6217 = vmatpush1.msra.mxu1 %v9448_v34  ;;  %5667 = vmatmul.mubr.f32.vlgmr.msra.gmra.mrb[24].mxu0 %v9409_v3  ;;  %v7299_v55 = vpack.c.bf16 %v5711_v0, %v5699_v53  ;;  %v6326_v24 = vand.u32 4294901760, %v6325_v1  ;;  %v6331_v56 = vsub.f32 %v9428_v26, %v6330_v49  ;;  %v5721_v30 = vand.u32 4294901760, %v9482_v12 }
 0x56f   : > { %6282 = vmatmul.mubr.f32.vlgmr.msra.gmra.mrb[24].mxu1 %v9409_v3  ;;  %5672 = vmatprep.mubr.f32.mxu0 %v7967_v6  ;;  %v5717_v31 = vand.u32 4294901760, %v5716_v52  ;;  %v6336_v46 = vand.u32 4294901760, %v9487_v28  ;;  %v5727_v17 = vand.u32 4294901760, %v9457_v35  ;;  %v6342_v4 = vand.u32 4294901760, %v9466_v18 }
 0x570   : > { %7300 = vmatprep.subr.bf16.mxu0 %v7299_v55  ;;  %v7323_v61 = vpack.c.bf16 %v6326_v24, %v6314_v10  ;;  %6287 = vmatprep.mubr.f32.mxu1 %v7967_v6  ;;  %v6332_v53 = vand.u32 4294901760, %v6331_v56  ;;  %v5722_v32 = vsub.f32 %v9482_v12, %v5721_v30  ;;  %v7303_v3 = vpack.c.bf16 %v9433_v11, %v9411_v13 }
 0x571   : > { %v7301_v22 = vpack.c.bf16 %v5717_v31, %v5705_v27  ;;  %v6337_v38 = vsub.f32 %v9487_v28, %v6336_v46  ;;  %v5728_v9 = vsub.f32 %v9457_v35, %v5727_v17  ;;  %v6343_v10 = vsub.f32 %v9466_v18, %v6342_v4 }
 0x572   : > { %7324 = vmatprep.subr.bf16.mxu1 %v7323_v61  ;;  %v7325_v47 = vpack.c.bf16 %v6332_v53, %v6320_v43  ;;  %5678 = vmatmul.mubr.f32.gmra.mrb[26].mxu0 %v9413_v25  ;;  %v5723_v0 = vand.u32 4294901760, %v5722_v32  ;;  %v7327_v11 = vpack.c.bf16 %v9441_v63, %v9417_v54  ;;  %v7305_v1 = vpack.c.bf16 %v9423_v33, %v9405_v48  ;;  %v7090_v54 = vld [vmem:[%s9724_s2 + $0x208] sm:$0xff] }
 0x573   : > { %7302 = vmatpush1.bf16.msra.mxu0 %v7301_v22  ;;  %6293 = vmatmul.mubr.f32.gmra.mrb[26].mxu1 %v9413_v25  ;;  %v6338_v27 = vand.u32 4294901760, %v6337_v38  ;;  %v7329_v52 = vpack.c.bf16 %v9428_v26, %v9407_v62  ;;  %v7311_v43 = vpack.c.bf16 %v5709_v19, %v5697_v44  ;;  %v7335_v55 = vpack.c.bf16 %v6324_v58, %v6312_v37  ;;  %v7089_v62 = vld [vmem:[%s9724_s2 + $0x200] sm:$0xff]  ;;  %v7095_v19 = vld [vmem:[%s9724_s2 + $0x230] sm:$0xf] }
 0x574   : > { %7326 = vmatpush1.bf16.msra.mxu1 %v7325_v47  ;;  %5724 = vmatprep.subr.mxu0 %v5723_v0  ;;  %v7313_v63 = vpack.c.bf16 %v5715_v20, %v5703_v59  ;;  %v5729_v33 = vand.u32 4294901760, %v5728_v9  ;;  %v7337_v25 = vpack.c.bf16 %v6330_v49, %v6318_v5  ;;  %v6344_v26 = vand.u32 4294901760, %v6343_v10  ;;  %v7092_v5 = vld [vmem:[%s9724_s2 + $0x218] sm:$0xff] }
 0x575   : > { %6339 = vmatprep.subr.mxu1 %v6338_v27  ;;  %5683 = vmatprep.mubr.f32.mxu0 %v7967_v6 }
 0x576   : > { %6298 = vmatprep.mubr.f32.mxu1 %v7967_v6  ;;  %5689 = vmatmul.mubr.f32.gmra.mrb[28].mxu0 %v9415_v16 }
 0x577   : > { %5730 = vmatpush1.msra.mxu0 %v5729_v33  ;;  %6304 = vmatmul.mubr.f32.gmra.mrb[28].mxu1 %v9415_v16  ;;  %v7091_v16 = vld [vmem:[%s9724_s2 + $0x210] sm:$0xff] }
 0x578   : > { %6345 = vmatpush1.msra.mxu1 %v6344_v26  ;;  %7304 = vmatprep.subr.bf16.mxu0 %v7303_v3 }
 0x579   : > { %7328 = vmatprep.subr.bf16.mxu1 %v7327_v11  ;;  %5789 = vmatprep.mubr.f32.mxu0 %v7967_v6 }
 0x57a   : > { %6404 = vmatprep.mubr.f32.mxu1 %v7967_v6  ;;  %5791 = vmatmul.mubr.f32.vlgmr.msra.gmra.mrb[24].mxu0 %v9351_v23 }
 0x57b   : > { %7306 = vmatpush1.bf16.msra.mxu0 %v7305_v1  ;;  %6406 = vmatmul.mubr.f32.vlgmr.msra.gmra.mrb[24].mxu1 %v9351_v23 }
 0x57c   : > { %7330 = vmatpush1.bf16.msra.mxu1 %v7329_v52  ;;  %5825 = vmatprep.subr.mxu0 %v9482_v12 }
 0x57d   : > { %6440 = vmatprep.subr.mxu1 %v9487_v28  ;;  %5796 = vmatprep.mubr.f32.mxu0 %v7967_v6 }
 0x57e   : > { %6411 = vmatprep.mubr.f32.mxu1 %v7967_v6  ;;  %5798 = vmatmul.mubr.f32.gmra.mrb[26].mxu0 %v9353_v15 }
 0x57f   : > { %5828 = vmatpush1.msra.mxu0 %v9457_v35  ;;  %6413 = vmatmul.mubr.f32.gmra.mrb[26].mxu1 %v9353_v15 }
 0x580   : > { %6443 = vmatpush1.msra.mxu1 %v9466_v18  ;;  %7308 = vmatprep.subr.bf16.mxu0 %v9431_v50 }
 0x581   : > { %7332 = vmatprep.subr.bf16.mxu1 %v9439_v29  ;;  %5803 = vmatprep.mubr.f32.mxu0 %v7967_v6 }
 0x582   : > { %6418 = vmatprep.mubr.f32.mxu1 %v7967_v6  ;;  %5805 = vmatmul.mubr.f32.gmra.mrb[28].mxu0 %v9358_v51 }
 0x583   : > { %6420 = vmatmul.mubr.f32.gmra.mrb[28].mxu1 %v9358_v51  ;;  %5887 = vmatprep.mubr.f32.mxu0 %v7967_v6 }
 0x584   : > { %6502 = vmatprep.mubr.f32.mxu1 %v7967_v6 }
 0x586   : > { %5890 = vmatmul.mubr.f32.vlgmr.msra.gmra.mrb[24].mxu0 %v9370_v57 }
 0x587   : > { %7310 = vmatpush1.bf16.msra.mxu0 %v9421_v45  ;;  %6505 = vmatmul.mubr.f32.vlgmr.msra.gmra.mrb[24].mxu1 %v9370_v57  ;;  %v7087_v57 = vld [vmem:[%s9724_s2 + $0x1f0] sm:$0xff] }
 0x588   : > { %7334 = vmatpush1.bf16.msra.mxu1 %v9426_v2  ;;  %5921 = vmatprep.subr.mxu0 %v9453_v60 }
 0x589   : > { %6536 = vmatprep.subr.mxu1 %v9463_v41  ;;  %5895 = vmatprep.mubr.f32.mxu0 %v7967_v6 }
 0x58a   : > { %6510 = vmatprep.mubr.f32.mxu1 %v7967_v6  ;;  %5898 = vmatmul.mubr.f32.gmra.mrb[26].mxu0 %v9373_v36 }
 0x58b   : > { %5923 = vmatpush1.msra.mxu0 %v9443_v39  ;;  %6513 = vmatmul.mubr.f32.gmra.mrb[26].mxu1 %v9373_v36 }
 0x58c   : > { %6538 = vmatpush1.msra.mxu1 %v9448_v34  ;;  %7312 = vmatprep.subr.bf16.mxu0 %v7311_v43 }
 0x58d   : > { %7336 = vmatprep.subr.bf16.mxu1 %v7335_v55  ;;  %5903 = vmatprep.mubr.f32.mxu0 %v7967_v6 }
 0x58e   : > { %6518 = vmatprep.mubr.f32.mxu1 %v7967_v6  ;;  %5906 = vmatmul.mubr.f32.gmra.mrb[28].mxu0 %v9379_v40 }
 0x58f   : > { %6521 = vmatmul.mubr.f32.gmra.mrb[28].mxu1 %v9379_v40  ;;  %5982 = vmatprep.mubr.f32.mxu0 %v7967_v6 }
 0x590   : > { %6597 = vmatprep.mubr.f32.mxu1 %v7967_v6 }
 0x592   : > { %5986 = vmatmul.mubr.f32.vlgmr.msra.gmra.mrb[24].mxu0 %v9391_v21 }
 0x593   : > { %7314 = vmatpush1.bf16.msra.mxu0 %v7313_v63  ;;  %6601 = vmatmul.mubr.f32.vlgmr.msra.gmra.mrb[24].mxu1 %v9391_v21 }
 0x594   : > { %7338 = vmatpush1.bf16.msra.mxu1 %v7337_v25  ;;  %6029 = vmatprep.subr.mxu0 %v5721_v30 }
 0x595   : > { %6644 = vmatprep.subr.mxu1 %v6336_v46  ;;  %5991 = vmatprep.mubr.f32.mxu0 %v7967_v6  ;;  %v6836_v46 = vpop.permute.xlu1 %6835 }
 0x596   : > { %6606 = vmatprep.mubr.f32.mxu1 %v7967_v6  ;;  %5995 = vmatmul.mubr.f32.gmra.mrb[26].mxu0 %v9394_v42 }
 0x597   : > { %6033 = vmatpush1.msra.mxu0 %v5727_v17  ;;  %6610 = vmatmul.mubr.f32.gmra.mrb[26].mxu1 %v9394_v42  ;;  %v6841_v17 = vpop.permute.xlu0 %6840 }
 0x598   : > { %6648 = vmatpush1.msra.mxu1 %v6342_v4  ;;  %7316 = vmatprep.subr.bf16.mxu0 %v9431_v50 }
 0x599   : > { %7340 = vmatprep.subr.bf16.mxu1 %v9439_v29  ;;  %6000 = vmatprep.mubr.f32.mxu0 %v7967_v6  ;;  %v6846_v55 = vpop.permute.xlu1 %6845 }
 0x59a   : > { %6615 = vmatprep.mubr.f32.mxu1 %v7967_v6  ;;  %6004 = vmatmul.mubr.f32.gmra.mrb[28].mxu0 %v9397_v14 }
 0x59b   : > { %6619 = vmatmul.mubr.f32.gmra.mrb[28].mxu1 %v9397_v14  ;;  %6092 = vmatprep.mubr.f32.mxu0 %v7967_v6 }
 0x59c   : > { %6707 = vmatprep.mubr.f32.mxu1 %v7967_v6 }
 0x59e   : > { %6094 = vmatmul.mubr.f32.vlgmr.msra.gmra.mrb[24].mxu0 %v9351_v23 }
 0x59f   : > { %7318 = vmatpush1.bf16.msra.mxu0 %v9421_v45  ;;  %6709 = vmatmul.mubr.f32.vlgmr.msra.gmra.mrb[24].mxu1 %v9351_v23 }
 0x5a0   : > { %7342 = vmatpush1.bf16.msra.mxu1 %v9426_v2  ;;  %6123 = vmatprep.subr.mxu0 %v9453_v60  ;;  %v7094_v60 = vld [vmem:[%s9724_s2 + $0x228] sm:$0xf] }
 0x5a1   : > { %6738 = vmatprep.subr.mxu1 %v9463_v41  ;;  %6099 = vmatprep.mubr.f32.mxu0 %v7967_v6  ;;  %v7096_v41 = vld [vmem:[%s9724_s2 + $0x238] sm:$0xf] }
 0x5a2   : > { %6714 = vmatprep.mubr.f32.mxu1 %v7967_v6  ;;  %6101 = vmatmul.mubr.f32.gmra.mrb[26].mxu0 %v9353_v15 }
 0x5a3   : > { %6125 = vmatpush1.msra.mxu0 %v9443_v39  ;;  %6716 = vmatmul.mubr.f32.gmra.mrb[26].mxu1 %v9353_v15  ;;  %v7093_v39 = vld [vmem:[%s9724_s2 + $0x220] sm:$0xf] }
 0x5a4   : > { %6740 = vmatpush1.msra.mxu1 %v9448_v34  ;;  %6106 = vmatprep.mubr.f32.mxu0 %v7967_v6 }
 0x5a5   : > { %6721 = vmatprep.mubr.f32.mxu1 %v7967_v6 }
 0x5a6   : > { %6108 = vmatmul.mubr.f32.gmra.mrb[28].mxu0 %v9358_v51 }
 0x5a7   : > { %6723 = vmatmul.mubr.f32.gmra.mrb[28].mxu1 %v9358_v51  ;;  %6184 = vmatprep.mubr.f32.mxu0 %v7967_v6 }
 0x5a8   : > { %6799 = vmatprep.mubr.f32.mxu1 %v7967_v6 }
 0x5aa   : > { %6186 = vmatmul.mubr.f32.vlgmr.msra.gmra.mrb[24].mxu0 %v9351_v23 }
 0x5ab   : > { %6801 = vmatmul.mubr.f32.vlgmr.msra.gmra.mrb[24].mxu1 %v9351_v23  ;;  %6191 = vmatprep.mubr.f32.mxu0 %v7967_v6  ;;  %v7085_v23 = vld [vmem:[%s9724_s2 + $0x1e0] sm:$0xff] }
 0x5ac   : > { %6806 = vmatprep.mubr.f32.mxu1 %v7967_v6 }
 0x5ae   : > { %6193 = vmatmul.mubr.f32.gmra.mrb[26].mxu0 %v9353_v15 }
 0x5af   : > { %6808 = vmatmul.mubr.f32.gmra.mrb[26].mxu1 %v9353_v15  ;;  %6198 = vmatprep.mubr.f32.mxu0 %v7967_v6  ;;  %v7086_v15 = vld [vmem:[%s9724_s2 + $0x1e8] sm:$0xff] }
 0x5b0   : > { %6813 = vmatprep.mubr.f32.mxu1 %v7967_v6  ;;  %v7088_v6 = vld [vmem:[%s9724_s2 + $0x1f8] sm:$0xff] }
 0x5b2   : > { %6200 = vmatmul.mubr.f32.gmra.mrb[28].mxu0 %v9358_v51 }
 0x5b3   : > { %6815 = vmatmul.mubr.f32.gmra.mrb[28].mxu1 %v9358_v51 }
 0x67d   : > { %v6187_v36 = vpop.f32.mrb[24].mxu0 }
 0x67e   : > { %v7391_v40 = vadd.f32 %v7085_v23, %v6187_v36  ;;  %v6802_v21 = vpop.f32.mrb[24].mxu1  ;;  %v6189_v51 = vpop.f32.mrb[25].mxu0 }
 0x67f   : > { %v7397_v42 = vadd.f32 %v7087_v57, %v6802_v21  ;;  %v7392_v14 = vadd.f32 %v7086_v15, %v6189_v51  ;;  %v6804_v48 = vpop.f32.mrb[25].mxu1 }
 0x680   : > { %7876 = vtanh.f32 %v7391_v40  ;;  %v7398_v13 = vadd.f32 %v7088_v6, %v6804_v48 }
 0x681   : > { %7878 = vtanh.f32 %v7397_v42  ;;  %v6194_v59 = vpop.f32.mrb[26].mxu0 }
 0x682   : > { %7880 = vtanh.f32 %v7392_v14  ;;  %v7393_v45 = vadd.f32 %v7089_v62, %v6194_v59  ;;  %v6809_v44 = vpop.f32.mrb[26].mxu1  ;;  %v6196_v2 = vpop.f32.mrb[27].mxu0 }
 0x683   : > { %7882 = vtanh.f32 %v7398_v13  ;;  %v7399_v37 = vadd.f32 %v7091_v16, %v6809_v44  ;;  %v7394_v50 = vadd.f32 %v7090_v54, %v6196_v2  ;;  %v6811_v29 = vpop.f32.mrb[27].mxu1 }
 0x684   : > { %7884 = vtanh.f32 %v7393_v45  ;;  %v7400_v34 = vadd.f32 %v7092_v5, %v6811_v29 }
 0x685   : > { %7886 = vtanh.f32 %v7399_v37  ;;  %v6201_v35 = vpop.f32.mrb[28].mxu0 }
 0x686   : > { %7888 = vtanh.f32 %v7394_v50  ;;  %v7395_v18 = vadd.f32 %v7093_v39, %v6201_v35  ;;  %v6816_v58 = vpop.f32.mrb[28].mxu1  ;;  %v6203_v20 = vpop.f32.mrb[29].mxu0 }
 0x687   : > { %7890 = vtanh.f32 %v7400_v34  ;;  %v7401_v49 = vadd.f32 %v7095_v19, %v6816_v58  ;;  %v7396_v12 = vadd.f32 %v7094_v60, %v6203_v20  ;;  %v6818_v28 = vpop.f32.mrb[29].mxu1  ;;  %v7968_v19 = vmov 1966171168   ;;  %v7018_v20 = vld [vmem:[%s9724_s2 + $0x240] sm:$0xff] }
 0x688   : > { %7892 = vtanh.f32 %v7395_v18  ;;  %v7402_v24 = vadd.f32 %v7096_v41, %v6818_v28  ;;  %v6907_v60 = vunpack.c.l.s4 %v7968_v19  ;;  %v7020_v28 = vld [vmem:[%s9724_s2 + $0x250] sm:$0xff] }
 0x689   : > { %7894 = vtanh.f32 %v7401_v49 }
 0x68a   : > { %v7877_v56 = vpop.eup %7876  ;;  %7896 = vtanh.f32 %v7396_v12 }
 0x68b   : > { %v7879_v30 = vpop.eup %7878  ;;  %7898 = vtanh.f32 %v7402_v24  ;;  %v6848_v32 = vmul.f32 %v7877_v56, %v6836_v46 }
 0x68c   : > { %v7881_v31 = vpop.eup %7880  ;;  %v6850_v38 = vmul.f32 %v7879_v30, %v6836_v46  ;;  %v6908_v30 = vunpack.c.0.s8 %v6907_v60 }
 0x68d   : > { %v7883_v4 = vpop.eup %7882  ;;  %v6849_v47 = vmul.f32 %v7881_v31, %v6836_v46  ;;  %v7019_v31 = vld [vmem:[%s9724_s2 + $0x248] sm:$0xff] }
 0x68e   : > { %v7885_v61 = vpop.eup %7884  ;;  %v6851_v27 = vmul.f32 %v7883_v4, %v6836_v46  ;;  %v7021_v4 = vld [vmem:[%s9724_s2 + $0x258] sm:$0xff] }
 0x68f   : > { %v7887_v53 = vpop.eup %7886  ;;  %v6852_v3 = vmul.f32 %v7885_v61, %v6841_v17 }
 0x690   : > { %v7889_v22 = vpop.eup %7888  ;;  %v6854_v9 = vmul.f32 %v7887_v53, %v6841_v17 }
 0x691   : > { %v7891_v10 = vpop.eup %7890  ;;  %v6853_v0 = vmul.f32 %v7889_v22, %v6841_v17  ;;  %v6860_v11 = vadd.f32 %v6852_v3, %v6848_v32 }
 0x692   : > { %v7893_v1 = vpop.eup %7892  ;;  %v6855_v52 = vmul.f32 %v7891_v10, %v6841_v17  ;;  %v6878_v43 = vadd.f32 %v6854_v9, %v6850_v38  ;;  %v6911_v38 = vsub.s32 %v6908_v30, %v8051_v8 }
 0x693   : > { %v7895_v63 = vpop.eup %7894  ;;  %v6869_v33 = vadd.f32 %v6853_v0, %v6849_v47  ;;  %v6856_v25 = vmul.f32 %v7893_v1, %v6846_v55 }
 0x694   : > { %v7897_v26 = vpop.eup %7896  ;;  %v6887_v23 = vadd.f32 %v6855_v52, %v6851_v27  ;;  %v6858_v57 = vmul.f32 %v7895_v63, %v6846_v55 }
 0x695   : > { %v7899_v15 = vpop.eup %7898  ;;  %v6857_v36 = vmul.f32 %v7897_v26, %v6846_v55  ;;  %v6861_v6 = vsel %vm458_vm1, %v6856_v25, 0.0 }
 0x696   : > { %v6859_v40 = vmul.f32 %v7899_v15, %v6846_v55  ;;  %v6862_v21 = vadd.f32 %v6861_v6, %v6860_v11  ;;  %v6879_v51 = vsel %vm458_vm1, %v6858_v57, 0.0 }
 0x697   : > { %v6870_v42 = vsel %vm458_vm1, %v6857_v36, 0.0  ;;  %v6880_v14 = vadd.f32 %v6879_v51, %v6878_v43 }
 0x698   : > { %v6863_v48 = vrot.slane %v6862_v21, 4  ;;  %v6871_v62 = vadd.f32 %v6870_v42, %v6869_v33  ;;  %v6888_v13 = vsel %vm458_vm1, %v6859_v40, 0.0 }
 0x699   : > { %v6881_v16 = vrot.slane %v6880_v14, 4  ;;  %v6889_v54 = vadd.f32 %v6888_v13, %v6887_v23 }
 0x69a   : > { %v6864_v59 = vadd.f32 %v6863_v48, %v6862_v21  ;;  %v6872_v5 = vrot.slane %v6871_v62, 4 }
 0x69b   : > { %v6882_v45 = vadd.f32 %v6881_v16, %v6880_v14  ;;  %v6890_v44 = vrot.slane %v6889_v54, 4 }
 0x69c   : > { %v6865_v2 = vrot.slane %v6864_v59, 2  ;;  %v6873_v37 = vadd.f32 %v6872_v5, %v6871_v62 }
 0x69d   : > { %v6883_v50 = vrot.slane %v6882_v45, 2  ;;  %v6891_v29 = vadd.f32 %v6890_v44, %v6889_v54 }
 0x69e   : > { %v6866_v39 = vadd.f32 %v6865_v2, %v6864_v59  ;;  %v6874_v34 = vrot.slane %v6873_v37, 2 }
 0x69f   : > { %v6884_v35 = vadd.f32 %v6883_v50, %v6882_v45  ;;  %v6892_v41 = vrot.slane %v6891_v29, 2 }
 0x6a0   : > { %v6867_v18 = vrot.slane %v6866_v39, 1  ;;  %v6875_v58 = vadd.f32 %v6874_v34, %v6873_v37 }
 0x6a1   : > { %v6885_v49 = vrot.slane %v6884_v35, 1  ;;  %v6893_v12 = vadd.f32 %v6892_v41, %v6891_v29 }
 0x6a2   : > { %v6868_v24 = vadd.f32 %v6867_v18, %v6866_v39  ;;  %v6876_v56 = vrot.slane %v6875_v58, 1 }
 0x6a3   : > { %v6886_v46 = vadd.f32 %v6885_v49, %v6884_v35  ;;  %v6894_v17 = vrot.slane %v6893_v12, 1 }
 0x6a4   : > { %v6877_v61 = vadd.f32 %v6876_v56, %v6875_v58  ;;  %v6896_v53 = vadd.f32 %v7018_v20, %v6868_v24 }
 0x6a5   : > { %v6895_v32 = vadd.f32 %v6894_v17, %v6893_v12  ;;  %v6898_v3 = vadd.f32 %v7020_v28, %v6886_v46 }
 0x6a6   : > { %v6897_v22 = vadd.f32 %v7019_v31, %v6877_v61 }
 0x6a7   : > { %v6899_v9 = vadd.f32 %v7021_v4, %v6895_v32 }
 0x6a8   : > { %v6904_v10 = vcombine.low %v6896_v53, %v6897_v22 }
 0x6a9   : > { %v6905_v47 = vcombine.low %v6898_v3, %v6899_v9 }
 0x6aa   : > { %v6912_v0 = vrot.slane %v6904_v10, %v6911_v38 }
 0x6ab   : > { %v6919_v11 = vrot.slane %v6905_v47, %v6911_v38 }
 0x6ad   : > { %v6920_v1 = vcombine.low %v6912_v0, %v6919_v11 }
 0x6af   : > { %v6927_v27 = vrot.slane %v6920_v1, %v6911_v38 }
 0x6b1   : > { %6933 = vst.msk [vmem:[%s164_s28] sm:$0xf] %vm6931_vm2, %v6927_v27 }
 0x6b2   : > { %7913 = shalt.err (!%p7910_p3)
}
 0x6b3   : > { %s7914_s10 = scalar_lea.hbm %s9680_s5, 64  ;;  %s7918_s19 = scalar_lea.hbm %s9725_s3, 128 }
 0x6b4   : > { %p7915_p4 = scmp.ne.s32.totalorder %s9680_s5, %s7914_s10  ;;  %p7919_p9 = scmp.lt.u32.totalorder %s9680_s5, %s9725_s3 }
 0x6b5   : > { %p7920_p10 = scmp.lt.u32.totalorder %s7918_s19, %s7914_s10  ;;  %p7922_p12 = scmp.lt.u32.totalorder %s7914_s10, %s9680_s5 }
 0x6b6   : > { %p7916_p7 = pnand %p7915_p4, %p8028_p5 }
 0x6b7   : > { %p7921_p11 = por %p7920_p10, %p7919_p9 }
 0x6b8   : > { %p7917_p8 = pneg %p7916_p7 }
 0x6b9   : > { %p7923_p13 = por %p7922_p12, %p7921_p11 }
 0x6bb   : > { %p7924_p0 = pnand %p7923_p13, %p7917_p8 }
 0x6bd   : > { %7927 = shalt.err (!%p7924_p0)
}
 0x6be   : > { %7703 = dma.vmem_to_hbm [thread:$0]  (%p8028_p5), %s9682_s29, 64, %s9680_s5, %s6935_s6  }
 0x6bf PF: > { %p7709_p1 = scmp.ge.s32.totalorder %s7962_s15, 2  ;;  %s6961_s25 = sand.u32 1, %s7950_s12  }
 0x6c0   : > { %s6962_s26 = scalar_lea.sflag [#allocation3], %s6961_s25 }
 0x6c1   : > { %p7706_p2 = pnand %p7709_p1, %p8032_p6 }
 0x6c3   : > { %7945 = dma.done.wait (!%p7706_p2), %s6962_s26, 64  }
 0x6c4   : > { %7947 = vsyncadd (!%p7706_p2), %s6962_s26, 4294967232  ;;  %p13_p3 = scmp.ge.s32.totalorder %s8015_s18, 4   ;;  %s9728_s12 = smov %s7954_s13 }
 0x6c5   : > { %s9729_s13 = smov %s7958_s14  ;;  %s9730_s14 = smov %s8026_s21 }
 0x6c6   : > { %s9731_s15 = smov %s8015_s18  ;;  %15 = sbr.rel (!%p13_p3) target bundleno = 3 (0x3), region = 79 }
 0x6cd   :  { %6967 = vsyncpa [#allocation3], 1 }
 0x6ce   :  { %6969 = vsyncpa [#allocation3 + $0x1], 1 }

</bundles_post_ra>
